<compile_context>
chip_gen: v7x
topology: tpu7x:2x2x1
jax: 0.10.0
libtpu: 0.0.40
codegen_flags: <defaults>
</compile_context>

<pallas_src>
import jax
import jax.numpy as jnp
from jax.experimental import pallas as pl
from jax.experimental.pallas import tpu as pltpu


def _round_up(x, m):
    return ((x + m - 1) // m) * m


def _scorer_kernel(q_ref, t_ref, r_ref, n_ref, w_ref, b_ref, o_ref):
    # q/t/r/n_ref: [TP, pack*E] (input dtype, VMEM, lane-dense packed rows)
    # w_ref:       [4, pack*E, pack] bf16 block-diagonal weights (resident)
    # b_ref:       [1] f32 (SMEM)
    # o_ref:       [TP, pack] bf16
    #
    # torch does cat(...).to(bfloat16): round each embedding to bf16 first.
    q = q_ref[...].astype(jnp.bfloat16)
    t = t_ref[...].astype(jnp.bfloat16)
    r = r_ref[...].astype(jnp.bfloat16)
    n = n_ref[...].astype(jnp.bfloat16)

    # bf16 MXU dots, f32 accumulation. Row-independent, so garbage rows in a
    # ragged last block only affect OOB output rows (whose writes are dropped).
    acc = jnp.dot(q, w_ref[0], preferred_element_type=jnp.float32)
    acc += jnp.dot(t, w_ref[1], preferred_element_type=jnp.float32)
    acc += jnp.dot(r, w_ref[2], preferred_element_type=jnp.float32)
    acc += jnp.dot(n, w_ref[3], preferred_element_type=jnp.float32)

    o_ref[...] = (acc + b_ref[0]).astype(o_ref.dtype)


def _xla_scorer(q_emb, task_emb, relation_emb, neighbor_emb, weight, bias):
    """Fused XLA path for small N (pallas_call fixed overhead would dominate)."""
    n, e = q_emb.shape
    w = weight.reshape(4, e).astype(jnp.bfloat16)
    acc = jnp.dot(q_emb.astype(jnp.bfloat16), w[0],
                  preferred_element_type=jnp.float32)
    acc += jnp.dot(task_emb.astype(jnp.bfloat16), w[1],
                   preferred_element_type=jnp.float32)
    acc += jnp.dot(relation_emb.astype(jnp.bfloat16), w[2],
                   preferred_element_type=jnp.float32)
    acc += jnp.dot(neighbor_emb.astype(jnp.bfloat16), w[3],
                   preferred_element_type=jnp.float32)
    return (acc + bias.reshape(1)[0].astype(jnp.float32)).astype(jnp.bfloat16)


def attention_scorer(q_emb, task_emb, relation_emb, neighbor_emb,
                     weight, bias, *,
                     tile_n=16384,                    # original rows per tile
                     vmem_tile_budget_bytes=28 << 20, # double-buffered tiles
                     vmem_limit_bytes=48 << 20,       # <= v7x 64 MiB physical
                     min_pallas_rows=4096,
                     use_pallas=None):
    """weight: [1, 4E] (torch Linear layout), bias: [1]. Returns bf16 [N]."""
    n, e = q_emb.shape

    if use_pallas is None:
        use_pallas = n >= min_pallas_rows
    if not use_pallas:
        return _xla_scorer(q_emb, task_emb, relation_emb, neighbor_emb,
                           weight, bias)

    # ---- lane packing: [N, E] -> [N/pack, pack*E] (free row-major reshape) --
    pack = 128 // e if (e <= 128 and 128 % e == 0) else 1
    pad_rows = (-n) % pack
    if pad_rows:
        # Only the tiny (< pack) remainder is padded; tiles never force a pad.
        def _pad(x):
            return jnp.pad(x, ((0, pad_rows), (0, 0)))
        q_emb, task_emb, relation_emb, neighbor_emb = map(
            _pad, (q_emb, task_emb, relation_emb, neighbor_emb))
    n_tot = n + pad_rows
    n_pack = n_tot // pack
    pw = pack * e                          # packed row width (== 128 for E=32)

    def _pack_rows(x):
        return x.reshape(n_pack, pw)

    q_p = _pack_rows(q_emb)
    t_p = _pack_rows(task_emb)
    r_p = _pack_rows(relation_emb)
    nb_p = _pack_rows(neighbor_emb)

    # ---- block-diagonal weights: W[j, p*E + e, c] = (p == c) * w_chunk_j[e] --
    # weight [1, 4E]; chunk order (q, task, relation, neighbor) matches cat.
    w_chunks = weight.reshape(4, e).astype(jnp.float32)            # [4, E]
    eye = jnp.eye(pack, dtype=jnp.float32)                          # [P, P]
    w_block = jnp.einsum('pc,je->jpec', eye, w_chunks)              # [4,P,E,P]
    w_block = w_block.reshape(4, pw, pack).astype(jnp.bfloat16)     # [4,PW,P]
    b = bias.reshape(1).astype(jnp.float32)

    # ---- tile sizing (lane-padding-aware VMEM budget) -----------------------
    itemsize = jnp.dtype(q_emb.dtype).itemsize
    pw_lanes = _round_up(pw, 128)                     # VMEM lane-padded width
    out_lanes = _round_up(pack, 128)                  # output lane padding
    bytes_per_packed_row = 2 * (4 * pw_lanes * itemsize      # 4 inputs, 2 bufs
                                + out_lanes * 2)             # bf16 out, 2 bufs
    max_tile_p = max(8, int(vmem_tile_budget_bytes) // bytes_per_packed_row)

    tile_p = max(1, int(tile_n) // pack)              # requested packed rows
    tile_p = min(tile_p, max_tile_p)
    # Guarantee >= 2 grid tiles when there is enough work (v7x: 2 TensorCores).
    tile_p = min(tile_p, max(8, _round_up(int(pl.cdiv(n_pack, 2)), 8)))
    tile_p = max(8, (tile_p // 8) * 8)

    n_tiles = int(pl.cdiv(n_pack, tile_p))            # ragged last block is OK

    emb_spec = pl.BlockSpec((tile_p, pw), lambda i: (i, 0))

    out = pl.pallas_call(
        _scorer_kernel,
        out_shape=jax.ShapeDtypeStruct((n_pack, pack), jnp.bfloat16),
        grid=(n_tiles,),
        in_specs=[
            emb_spec,                                            # q (packed)
            emb_spec,                                            # task
            emb_spec,                                            # relation
            emb_spec,                                            # neighbor
            pl.BlockSpec((4, pw, pack), lambda i: (0, 0, 0)),    # weights
            pl.BlockSpec(memory_space=pltpu.MemorySpace.SMEM),   # bias scalar
        ],
        out_specs=pl.BlockSpec((tile_p, pack), lambda i: (i, 0)),
        compiler_params=pltpu.CompilerParams(
            dimension_semantics=("parallel",),
            vmem_limit_bytes=int(vmem_limit_bytes),
        ),
    )(q_p, t_p, r_p, nb_p, w_block, b)

    # [n_pack, pack] row-major == original row order; drop pad rows, squeeze.
    return out.reshape(-1)[:n]


def _reference(q_emb, task_emb, relation_emb, neighbor_emb, weight, bias):
    """Pure-JAX reference with the torch semantics (cat -> bf16 -> Linear)."""
    comb = jnp.concatenate(
        [q_emb, task_emb, relation_emb, neighbor_emb], axis=1
    ).astype(jnp.bfloat16).astype(jnp.float32)
    out = comb @ weight.reshape(-1).astype(jnp.float32) + bias.reshape(1)[0]
    return out.astype(jnp.bfloat16)


if __name__ == "__main__":
    embedding_dim = 32

    key = jax.random.PRNGKey(0)
    kq, kt, kr, kn, kw, kb = jax.random.split(key, 6)

    # Deterministic nn.Linear(4E, 1) init: U(-1/sqrt(in), 1/sqrt(in))
    in_features = embedding_dim * 4
    bound = 1.0 / (in_features ** 0.5)
    weight = jax.random.uniform(kw, (1, in_features), jnp.float32, -bound, bound)
    bias = jax.random.uniform(kb, (1,), jnp.float32, -bound, bound)

    def make_inputs(batch):
        ks = jax.random.split(jax.random.fold_in(key, batch), 4)
        return tuple(jax.random.normal(k, (batch, embedding_dim), jnp.float32)
                     for k in ks)

    # --- 1) tiny batch (module-scale shapes): exercises the small-N XLA path
    small_in = make_inputs(8)
    out_small = jax.block_until_ready(
        attention_scorer(*small_in, weight, bias))
    ref_small = _reference(*small_in, weight, bias)
    assert out_small.shape == (8,) and out_small.dtype == jnp.bfloat16
    assert jnp.allclose(out_small.astype(jnp.float32),
                        ref_small.astype(jnp.float32), rtol=2e-2, atol=2e-2)

    # --- 2) ragged batch, forced Pallas path: N % pack != 0 and N % tile != 0
    #         (covers remainder padding, ragged last block, multi-tile grid).
    n_big = 8229
    big_in = make_inputs(n_big)
    out_big = jax.block_until_ready(
        attention_scorer(*big_in, weight, bias, use_pallas=True, tile_n=2048))
    ref_big = _reference(*big_in, weight, bias)
    assert out_big.shape == (n_big,) and out_big.dtype == jnp.bfloat16
    assert jnp.allclose(out_big.astype(jnp.float32),
                        ref_big.astype(jnp.float32), rtol=2e-2, atol=2e-2)

    print("KERNEL_OK")
</pallas_src>

<mosaic_0001>
module attributes {stable_mosaic.version = 11 : i64} {
  func.func @_scorer_kernel(%arg0: i32, %arg1: memref<512x128xf32, #tpu.memory_space<vmem>>, %arg2: memref<512x128xf32, #tpu.memory_space<vmem>>, %arg3: memref<512x128xf32, #tpu.memory_space<vmem>>, %arg4: memref<512x128xf32, #tpu.memory_space<vmem>>, %arg5: memref<4x128x4xbf16, #tpu.memory_space<vmem>>, %arg6: memref<1xf32, #tpu.memory_space<smem>>, %arg7: memref<512x4xbf16, #tpu.memory_space<vmem>>) attributes {dimension_semantics = [#tpu.dimension_semantics<parallel>], iteration_bounds = array<i64: 5>, scalar_prefetch = 0 : i64, scratch_operands = 0 : i64, tpu.core_type = #tpu.core_type<tc>, window_params = [{transform_indices = @transform_0, window_bounds = array<i64: 512, 128>}, {transform_indices = @transform_1, window_bounds = array<i64: 512, 128>}, {transform_indices = @transform_2, window_bounds = array<i64: 512, 128>}, {transform_indices = @transform_3, window_bounds = array<i64: 512, 128>}, {pipeline_mode = #tpu.pipeline_mode<synchronous>, transform_indices = @transform_4, window_bounds = array<i64: 4, 128, 4>}, {transform_indices = @transform_5, window_bounds = array<i64: 1>}, {transform_indices = @transform_6, window_bounds = array<i64: 512, 4>}]} {
    %c0 = arith.constant 0 : index
    %c0_0 = arith.constant 0 : index
    %0 = vector.load %arg1[%c0, %c0_0] : memref<512x128xf32, #tpu.memory_space<vmem>>, vector<512x128xf32>
    %1 = arith.truncf %0 : vector<512x128xf32> to vector<512x128xbf16>
    %c0_1 = arith.constant 0 : index
    %c0_2 = arith.constant 0 : index
    %2 = vector.load %arg2[%c0_1, %c0_2] : memref<512x128xf32, #tpu.memory_space<vmem>>, vector<512x128xf32>
    %3 = arith.truncf %2 : vector<512x128xf32> to vector<512x128xbf16>
    %c0_3 = arith.constant 0 : index
    %c0_4 = arith.constant 0 : index
    %4 = vector.load %arg3[%c0_3, %c0_4] : memref<512x128xf32, #tpu.memory_space<vmem>>, vector<512x128xf32>
    %5 = arith.truncf %4 : vector<512x128xf32> to vector<512x128xbf16>
    %c0_5 = arith.constant 0 : index
    %c0_6 = arith.constant 0 : index
    %6 = vector.load %arg4[%c0_5, %c0_6] : memref<512x128xf32, #tpu.memory_space<vmem>>, vector<512x128xf32>
    %7 = arith.truncf %6 : vector<512x128xf32> to vector<512x128xbf16>
    %c0_7 = arith.constant 0 : index
    %c0_8 = arith.constant 0 : index
    %c0_9 = arith.constant 0 : index
    %8 = vector.load %arg5[%c0_7, %c0_8, %c0_9] : memref<4x128x4xbf16, #tpu.memory_space<vmem>>, vector<1x128x4xbf16>
    %9 = vector.shape_cast %8 : vector<1x128x4xbf16> to vector<128x4xbf16>
    %cst = arith.constant dense<0.000000e+00> : vector<512x4xf32>
    %10 = tpu.matmul %1, %9, %cst {dimension_numbers = #tpu.dot_dimension_numbers<[1], [0], [0], [1], [0, 0, 1, 1], [], []>} : vector<512x128xbf16>, vector<128x4xbf16>, vector<512x4xf32> -> vector<512x4xf32>
    %c1 = arith.constant 1 : index
    %c0_10 = arith.constant 0 : index
    %c0_11 = arith.constant 0 : index
    %11 = vector.load %arg5[%c1, %c0_10, %c0_11] : memref<4x128x4xbf16, #tpu.memory_space<vmem>>, vector<1x128x4xbf16>
    %12 = vector.shape_cast %11 : vector<1x128x4xbf16> to vector<128x4xbf16>
    %cst_12 = arith.constant dense<0.000000e+00> : vector<512x4xf32>
    %13 = tpu.matmul %3, %12, %cst_12 {dimension_numbers = #tpu.dot_dimension_numbers<[1], [0], [0], [1], [0, 0, 1, 1], [], []>} : vector<512x128xbf16>, vector<128x4xbf16>, vector<512x4xf32> -> vector<512x4xf32>
    %14 = arith.addf %10, %13 : vector<512x4xf32>
    %c2 = arith.constant 2 : index
    %c0_13 = arith.constant 0 : index
    %c0_14 = arith.constant 0 : index
    %15 = vector.load %arg5[%c2, %c0_13, %c0_14] : memref<4x128x4xbf16, #tpu.memory_space<vmem>>, vector<1x128x4xbf16>
    %16 = vector.shape_cast %15 : vector<1x128x4xbf16> to vector<128x4xbf16>
    %cst_15 = arith.constant dense<0.000000e+00> : vector<512x4xf32>
    %17 = tpu.matmul %5, %16, %cst_15 {dimension_numbers = #tpu.dot_dimension_numbers<[1], [0], [0], [1], [0, 0, 1, 1], [], []>} : vector<512x128xbf16>, vector<128x4xbf16>, vector<512x4xf32> -> vector<512x4xf32>
    %18 = arith.addf %14, %17 : vector<512x4xf32>
    %c3 = arith.constant 3 : index
    %c0_16 = arith.constant 0 : index
    %c0_17 = arith.constant 0 : index
    %19 = vector.load %arg5[%c3, %c0_16, %c0_17] : memref<4x128x4xbf16, #tpu.memory_space<vmem>>, vector<1x128x4xbf16>
    %20 = vector.shape_cast %19 : vector<1x128x4xbf16> to vector<128x4xbf16>
    %cst_18 = arith.constant dense<0.000000e+00> : vector<512x4xf32>
    %21 = tpu.matmul %7, %20, %cst_18 {dimension_numbers = #tpu.dot_dimension_numbers<[1], [0], [0], [1], [0, 0, 1, 1], [], []>} : vector<512x128xbf16>, vector<128x4xbf16>, vector<512x4xf32> -> vector<512x4xf32>
    %22 = arith.addf %18, %21 : vector<512x4xf32>
    %c0_19 = arith.constant 0 : index
    %23 = memref.load %arg6[%c0_19] : memref<1xf32, #tpu.memory_space<smem>>
    %24 = vector.broadcast %23 : f32 to vector<512x4xf32>
    %25 = arith.addf %22, %24 : vector<512x4xf32>
    %26 = arith.truncf %25 : vector<512x4xf32> to vector<512x4xbf16>
    %c0_20 = arith.constant 0 : index
    %c0_21 = arith.constant 0 : index
    %27 = vector.load %arg7[%c0_20, %c0_21] : memref<512x4xbf16, #tpu.memory_space<vmem>>, vector<512x4xbf16>
    tpu.vector_store %arg7[%c0_20, %c0_21], %26 {strides = array<i32>} : memref<512x4xbf16, #tpu.memory_space<vmem>>, vector<512x4xbf16>,
    return
  }
  func.func @transform_0(%arg0: i32) -> (i32, i32) {
    %c0_i32 = arith.constant 0 : i32
    %c0_i32_0 = arith.constant 0 : i32
    return %arg0, %c0_i32 : i32, i32
  }
  func.func @transform_1(%arg0: i32) -> (i32, i32) {
    %c0_i32 = arith.constant 0 : i32
    %c0_i32_0 = arith.constant 0 : i32
    return %arg0, %c0_i32 : i32, i32
  }
  func.func @transform_2(%arg0: i32) -> (i32, i32) {
    %c0_i32 = arith.constant 0 : i32
    %c0_i32_0 = arith.constant 0 : i32
    return %arg0, %c0_i32 : i32, i32
  }
  func.func @transform_3(%arg0: i32) -> (i32, i32) {
    %c0_i32 = arith.constant 0 : i32
    %c0_i32_0 = arith.constant 0 : i32
    return %arg0, %c0_i32 : i32, i32
  }
  func.func @transform_4(%arg0: i32) -> (i32, i32, i32) {
    %c0_i32 = arith.constant 0 : i32
    %c0_i32_0 = arith.constant 0 : i32
    %c0_i32_1 = arith.constant 0 : i32
    %c0_i32_2 = arith.constant 0 : i32
    return %c0_i32, %c0_i32_0, %c0_i32_1 : i32, i32, i32
  }
  func.func @transform_5(%arg0: i32) -> i32 {
    %c0_i32 = arith.constant 0 : i32
    %c0_i32_0 = arith.constant 0 : i32
    return %c0_i32 : i32
  }
  func.func @transform_6(%arg0: i32) -> (i32, i32) {
    %c0_i32 = arith.constant 0 : i32
    %c0_i32_0 = arith.constant 0 : i32
    return %arg0, %c0_i32 : i32, i32
  }
}

</mosaic_0001>

<bundles_post_ra>
// kernel: tpu_custom_call.1
= control target key start
LH: loop header
LB: loop body
LE: loop exit
PB: predicated region body
PF: predicated region fallthrough
CT: control target
= control target key end

     0   :  { %s5649_s0 = inlined_call_operand.hbm [shape: f32[2058,128], index: 0, kind: input, shape index: {}]   ;;  %s5650_s1 = inlined_call_operand.hbm [shape: f32[2058,128], index: 1, kind: input, shape index: {}]   ;;  %s5651_s2 = inlined_call_operand.hbm [shape: f32[2058,128], index: 2, kind: input, shape index: {}]   ;;  %s5652_s3 = inlined_call_operand.hbm [shape: f32[2058,128], index: 3, kind: input, shape index: {}]   ;;  %s5653_s4 = inlined_call_operand.vmem [shape: bf16[4,128,4], index: 4, kind: input, shape index: {}]   ;;  %s5654_s5 = inlined_call_operand.<no memory space> [shape: f32[1], index: 5, kind: input, shape index: {}]   ;;  %s5655_s6 = inlined_call_operand.vmem [shape: bf16[2058,4], index: 6, kind: output, shape index: {}]  }
   0x1   :  { %11 = sst [smem:[#allocation2]] %s5654_s5 }
   0x2   :  { %12 = vsyncpa [#allocation4], 0 }
   0x3   :  { %14 = vsyncpa [#allocation4 + $0x1], 0 }
   0x4   :  { %15 = vsyncpa [#allocation6], 0 }
   0x5   :  { %17 = vsyncpa [#allocation6 + $0x1], 0 }
   0x6   :  { %18 = vsyncpa [#allocation9], 0 }
   0x7   :  { %20 = vsyncpa [#allocation9 + $0x1], 0  ;;  %s4642_s23 = smov 0   ;;  %s4644_s24 = smov 0  }
   0x8   :  { %s4646_s25 = smov 0   ;;  %s4648_s26 = smov 0  }
   0x9 LB: > { %s4661_s5 = sadd.s32 4294967295, %s4558_s26   ;;  %s4664_s27 = sadd.s32 1, %s4558_s26   ;;  %s4558_s26 = sphi %s4648_s26, %s5666_s26   ;;  %s4554_s25 = sphi %s4646_s25, %s5665_s25   ;;  %s4550_s24 = sphi %s4644_s24, %s5664_s24   ;;  %s4546_s23 = sphi %s4642_s23, %s5663_s23  }
   0xa   : > { %s30_s28 = ssub.s32 %s4558_s26, %s4664_s27  ;;  %s33_s29 = sadd.s32 1, %s4554_s25 }
   0xb   : > { %p31_p0 = scmp.eq.s32.totalorder %s30_s28, 0  ;;  %p40_p1 = scmp.ne.s32.totalorder %s4554_s25, %s4550_s24 }
   0xc   : > { %p41_p2 = scmp.eq.s32.totalorder %s4558_s26, 0  ;;  %p46_p3 = scmp.ne.s32.totalorder %s4550_s24, %s4546_s23 }
   0xd   : > { %s4674_s30 = scalar_select %p31_p0, %s4554_s25, %s33_s29  }
   0xe   : > { %p4676_p4 = por %p41_p2, %p40_p1  ;;  %p47_p5 = scmp.eq.s32.totalorder %s4661_s5, 0 }
   0xf   : > { %p190_p6 = scmp.eq.s32.totalorder %s4661_s5, 4  ;;  %p3293_p9 = scmp.ge.s32.totalorder %s4558_s26, 5 }
  0x10   : > { %p4682_p7 = por %p47_p5, %p46_p3 }
  0x11   : > { %p4686_p8 = por %p190_p6, %p40_p1  ;;  %218 = sbr.rel (%p3293_p9) target bundleno = 164 (0xa4), region = 24 }
  0x13   : > { %s5658_s9 = scalar_select %p4686_p8, 1, 0 }
  0x18   : > { %221 = sbr.rel (!%p4676_p4) target bundleno = 59 (0x3b), region = 28  ;;  %s222_s10 = sand.u32 (%p4676_p4), 1, %s4554_s25  }
  0x19   : > { %s3295_s11 = sshll.u32 (%p4676_p4), %s4558_s26, 6  ;;  %s3294_s12 = sshll.u32 (%p4676_p4), %s222_s10, 9 }
  0x1a   : > { %s228_s13 = ssub.s32 (%p4676_p4), 258, %s3295_s11  ;;  %s4698_s16 = scalar_lea.sflag (%p4676_p4), [#allocation4], %s222_s10 }
  0x1b   : > { %p229_p10 = scmp.lt.s32.totalorder (%p4676_p4), %s228_s13, 64  ;;  %s226_s17 = scalar_lea.vmem (%p4676_p4), [#allocation3], %s3294_s12 }
  0x1f   : > { %s5668_s13 = smov (!%p229_p10, %s228_s13), 64 }
  0x20   : > { %s4695_s14 = sshll.u32 %s5668_s13, 7 }
  0x21   : > { %s233_s15 = ssub.s32 8192, %s4695_s14 }
  0x22   : > { %234 = vsyncadd %s4698_s16, %s233_s15  ;;  %p3297_p11 = scmp.ne.s32.totalorder %s4695_s14, 0  ;;  %s3489_s18 = sshll.u32 %s4558_s26, 13 }
  0x23   : > { %s4706_s21 = scalar_lea.hbm %s5649_s0, %s3489_s18  ;;  %s239_s22 = sshll.u32 %s226_s17, 4  ;;  %s4708_s22 = int_to_ptr.vmem [resolvable:$true] %s239_s22 }
  0x24   : > { %s4372_s23 = scalar_lea.hbm %s4706_s21, %s4695_s14  ;;  %s4376_s10 = scalar_lea.hbm %s5649_s0, 33024 }
  0x25   : > { %p4373_p12 = scmp.ne.s32.totalorder %s4706_s21, %s4372_s23  ;;  %p4377_p1 = scmp.lt.u32.totalorder %s4706_s21, %s5649_s0 }
  0x26   : > { %p4378_p2 = scmp.lt.u32.totalorder %s4376_s10, %s4372_s23  ;;  %p4380_p5 = scmp.lt.u32.totalorder %s4372_s23, %s4706_s21 }
  0x27   : > { %p4374_p13 = pnand %p4373_p12, %p3297_p11 }
  0x28   : > { %p4379_p3 = por %p4378_p2, %p4377_p1 }
  0x29   : > { %p4375_p0 = pneg %p4374_p13 }
  0x2a   : > { %p4381_p6 = por %p4380_p5, %p4379_p3 }
  0x2c   : > { %p4382_p9 = pnand %p4381_p6, %p4375_p0 }
  0x2e   : > { %4385 = shalt.err (!%p4382_p9)
}
  0x2f   : > { %s4386_s13 = scalar_lea.vmem %s4708_s22, %s4695_s14  ;;  %s4592_s15 = smov [#allocation3]  }
  0x30   : > { %p4387_p10 = scmp.ne.s32.totalorder %s4708_s22, %s4386_s13  ;;  %s4390_s17 = sshll.u32 %s4592_s15, 4  ;;  %s4391_s17 = int_to_ptr.vmem [resolvable:$false] %s4390_s17 }
  0x31   : > { %s4392_s18 = scalar_lea.vmem %s4391_s17, 16384  ;;  %p4393_p8 = scmp.lt.s32.totalorder %s4708_s22, %s4391_s17 }
  0x32   : > { %p4388_p12 = pnand %p4387_p10, %p3297_p11  ;;  %p4394_p1 = scmp.lt.s32.totalorder %s4392_s18, %s4386_s13 }
  0x34   : > { %p4389_p13 = pneg %p4388_p12  ;;  %p4395_p2 = por %p4394_p1, %p4393_p8 }
  0x36   : > { %p4396_p3 = pnand %p4395_p2, %p4389_p13 }
  0x38   : > { %4399 = shalt.err (!%p4396_p3)
}
  0x39   : > { %s4593_s19 = smov 128   ;;  %s4594_s20 = smov 8  }
  0x3a   : > { %245 = dma.hbm_to_vmem [thread:$0]  (%p3297_p11), %s4706_s21, %s4695_s14, %s4708_s22, %s4698_s16, %s4593_s19, %s4593_s19, %s4594_s20  }
  0x3b PF: > { %248 = sbr.rel (!%p4676_p4) target bundleno = 94 (0x5e), region = 32  ;;  %s249_s23 = sand.u32 (%p4676_p4), 1, %s4558_s26  }
  0x3c   : > { %s251_s28 = sand.u32 (%p4676_p4), 1, %s4554_s25   ;;  %s3302_s10 = sshll.u32 (%p4676_p4), %s4558_s26, 6 }
  0x3d   : > { %s3301_s29 = sshll.u32 (%p4676_p4), %s251_s28, 9  ;;  %s255_s11 = ssub.s32 (%p4676_p4), 258, %s3302_s10 }
  0x3e   : > { %p256_p8 = scmp.lt.s32.totalorder (%p4676_p4), %s255_s11, 64  ;;  %s4743_s15 = scalar_lea.sflag (%p4676_p4), [#allocation6], %s249_s23 }
  0x3f   : > { %s253_s14 = scalar_lea.vmem (%p4676_p4), [#allocation5], %s3301_s29 }
  0x42   : > { %s5670_s11 = smov (!%p256_p8, %s255_s11), 64 }
  0x43   : > { %s4740_s12 = sshll.u32 %s5670_s11, 7 }
  0x44   : > { %s260_s13 = ssub.s32 8192, %s4740_s12 }
  0x45   : > { %261 = vsyncadd %s4743_s15, %s260_s13  ;;  %p3304_p11 = scmp.ne.s32.totalorder %s4740_s12, 0  ;;  %s3490_s16 = sshll.u32 %s4558_s26, 13 }
  0x46   : > { %s4751_s17 = scalar_lea.hbm %s5650_s1, %s3490_s16  ;;  %s266_s18 = sshll.u32 %s253_s14, 4  ;;  %s4753_s18 = int_to_ptr.vmem [resolvable:$true] %s266_s18 }
  0x47   : > { %s4400_s19 = scalar_lea.hbm %s4751_s17, %s4740_s12  ;;  %s4404_s28 = scalar_lea.hbm %s5650_s1, 33024 }
  0x48   : > { %p4401_p0 = scmp.ne.s32.totalorder %s4751_s17, %s4400_s19  ;;  %p4405_p9 = scmp.lt.u32.totalorder %s4751_s17, %s5650_s1 }
  0x49   : > { %p4406_p10 = scmp.lt.u32.totalorder %s4404_s28, %s4400_s19  ;;  %p4408_p13 = scmp.lt.u32.totalorder %s4400_s19, %s4751_s17 }
  0x4a   : > { %p4402_p5 = pnand %p4401_p0, %p3304_p11 }
  0x4b   : > { %p4407_p12 = por %p4406_p10, %p4405_p9 }
  0x4c   : > { %p4403_p6 = pneg %p4402_p5 }
  0x4d   : > { %p4409_p1 = por %p4408_p13, %p4407_p12 }
  0x4f   : > { %p4410_p2 = pnand %p4409_p1, %p4403_p6 }
  0x51   : > { %4413 = shalt.err (!%p4410_p2)
}
  0x52   : > { %s4414_s11 = scalar_lea.vmem %s4753_s18, %s4740_s12  ;;  %s4595_s13 = smov [#allocation5]  }
  0x53   : > { %p4415_p3 = scmp.ne.s32.totalorder %s4753_s18, %s4414_s11  ;;  %s4418_s14 = sshll.u32 %s4595_s13, 4  ;;  %s4419_s14 = int_to_ptr.vmem [resolvable:$false] %s4418_s14 }
  0x54   : > { %s4420_s16 = scalar_lea.vmem %s4419_s14, 16384  ;;  %p4421_p5 = scmp.lt.s32.totalorder %s4753_s18, %s4419_s14 }
  0x55   : > { %p4416_p8 = pnand %p4415_p3, %p3304_p11  ;;  %p4422_p9 = scmp.lt.s32.totalorder %s4420_s16, %s4414_s11 }
  0x57   : > { %p4417_p0 = pneg %p4416_p8  ;;  %p4423_p10 = por %p4422_p9, %p4421_p5 }
  0x59   : > { %p4424_p12 = pnand %p4423_p10, %p4417_p0 }
  0x5b   : > { %4427 = shalt.err (!%p4424_p12)
}
  0x5c   : > { %s4596_s21 = smov 128   ;;  %s4597_s22 = smov 8  }
  0x5d   : > { %272 = dma.hbm_to_vmem [thread:$0]  (%p3304_p11), %s4751_s17, %s4740_s12, %s4753_s18, %s4743_s15, %s4596_s21, %s4596_s21, %s4597_s22  }
  0x5e PF: > { %275 = sbr.rel (!%p4676_p4) target bundleno = 129 (0x81), region = 36  ;;  %s276_s19 = sand.u32 (%p4676_p4), 1, %s4558_s26  }
  0x5f   : > { %s278_s20 = sand.u32 (%p4676_p4), 1, %s4554_s25   ;;  %s3309_s28 = sshll.u32 (%p4676_p4), %s4558_s26, 6 }
  0x60   : > { %s3308_s23 = sshll.u32 (%p4676_p4), %s278_s20, 9  ;;  %s282_s29 = ssub.s32 (%p4676_p4), 258, %s3309_s28 }
  0x61   : > { %p283_p6 = scmp.lt.s32.totalorder (%p4676_p4), %s282_s29, 64  ;;  %s4788_s13 = scalar_lea.sflag (%p4676_p4), [#allocation6], %s276_s19 }
  0x62   : > { %s280_s12 = scalar_lea.vmem (%p4676_p4), [#allocation7], %s3308_s23 }
  0x65   : > { %s5672_s29 = smov (!%p283_p6, %s282_s29), 64 }
  0x66   : > { %s4785_s10 = sshll.u32 %s5672_s29, 7 }
  0x67   : > { %s287_s11 = ssub.s32 8192, %s4785_s10 }
  0x68   : > { %288 = vsyncadd %s4788_s13, %s287_s11  ;;  %p3311_p11 = scmp.ne.s32.totalorder %s4785_s10, 0  ;;  %s3491_s15 = sshll.u32 %s4558_s26, 13 }
  0x69   : > { %s4796_s14 = scalar_lea.hbm %s5651_s2, %s3491_s15  ;;  %s293_s16 = sshll.u32 %s280_s12, 4  ;;  %s4798_s16 = int_to_ptr.vmem [resolvable:$true] %s293_s16 }
  0x6a   : > { %s4428_s21 = scalar_lea.hbm %s4796_s14, %s4785_s10  ;;  %s4432_s20 = scalar_lea.hbm %s5651_s2, 33024 }
  0x6b   : > { %p4429_p13 = scmp.ne.s32.totalorder %s4796_s14, %s4428_s21  ;;  %p4433_p3 = scmp.lt.u32.totalorder %s4796_s14, %s5651_s2 }
  0x6c   : > { %p4434_p8 = scmp.lt.u32.totalorder %s4432_s20, %s4428_s21  ;;  %p4436_p5 = scmp.lt.u32.totalorder %s4428_s21, %s4796_s14 }
  0x6d   : > { %p4430_p1 = pnand %p4429_p13, %p3311_p11 }
  0x6e   : > { %p4435_p0 = por %p4434_p8, %p4433_p3 }
  0x6f   : > { %p4431_p2 = pneg %p4430_p1 }
  0x70   : > { %p4437_p9 = por %p4436_p5, %p4435_p0 }
  0x72   : > { %p4438_p10 = pnand %p4437_p9, %p4431_p2 }
  0x74   : > { %4441 = shalt.err (!%p4438_p10)
}
  0x75   : > { %s4442_s29 = scalar_lea.vmem %s4798_s16, %s4785_s10  ;;  %s4598_s11 = smov [#allocation7]  }
  0x76   : > { %p4443_p12 = scmp.ne.s32.totalorder %s4798_s16, %s4442_s29  ;;  %s4446_s12 = sshll.u32 %s4598_s11, 4  ;;  %s4447_s12 = int_to_ptr.vmem [resolvable:$false] %s4446_s12 }
  0x77   : > { %s4448_s15 = scalar_lea.vmem %s4447_s12, 16384  ;;  %p4449_p1 = scmp.lt.s32.totalorder %s4798_s16, %s4447_s12 }
  0x78   : > { %p4444_p6 = pnand %p4443_p12, %p3311_p11  ;;  %p4450_p3 = scmp.lt.s32.totalorder %s4448_s15, %s4442_s29 }
  0x7a   : > { %p4445_p13 = pneg %p4444_p6  ;;  %p4451_p8 = por %p4450_p3, %p4449_p1 }
  0x7c   : > { %p4452_p0 = pnand %p4451_p8, %p4445_p13 }
  0x7e   : > { %4455 = shalt.err (!%p4452_p0)
}
  0x7f   : > { %s4599_s17 = smov 128   ;;  %s4600_s18 = smov 8  }
  0x80   : > { %299 = dma.hbm_to_vmem [thread:$0]  (%p3311_p11), %s4796_s14, %s4785_s10, %s4798_s16, %s4788_s13, %s4599_s17, %s4599_s17, %s4600_s18  }
  0x81 PF: > { %302 = sbr.rel (!%p4676_p4) target bundleno = 164 (0xa4), region = 40  ;;  %s303_s21 = sand.u32 (%p4676_p4), 1, %s4554_s25  }
  0x82   : > { %s3316_s22 = sshll.u32 (%p4676_p4), %s4558_s26, 6  ;;  %s3315_s19 = sshll.u32 (%p4676_p4), %s303_s21, 9 }
  0x83   : > { %s309_s20 = ssub.s32 (%p4676_p4), 258, %s3316_s22  ;;  %s4832_s29 = scalar_lea.sflag (%p4676_p4), [#allocation9], %s303_s21 }
  0x84   : > { %p310_p2 = scmp.lt.s32.totalorder (%p4676_p4), %s309_s20, 64  ;;  %s307_s10 = scalar_lea.vmem (%p4676_p4), [#allocation8], %s3315_s19 }
  0x88   : > { %s5674_s20 = smov (!%p310_p2, %s309_s20), 64 }
  0x89   : > { %s4829_s23 = sshll.u32 %s5674_s20, 7 }
  0x8a   : > { %s314_s28 = ssub.s32 8192, %s4829_s23 }
  0x8b   : > { %315 = vsyncadd %s4832_s29, %s314_s28  ;;  %p3318_p4 = scmp.ne.s32.totalorder %s4829_s23, 0  ;;  %s3492_s7 = sshll.u32 %s4558_s26, 13 }
  0x8c   : > { %s4840_s16 = scalar_lea.hbm %s5652_s3, %s3492_s7  ;;  %s320_s11 = sshll.u32 %s307_s10, 4  ;;  %s4842_s11 = int_to_ptr.vmem [resolvable:$true] %s320_s11 }
  0x8d   : > { %s4456_s12 = scalar_lea.hbm %s4840_s16, %s4829_s23  ;;  %s4460_s18 = scalar_lea.hbm %s5652_s3, 33024 }
  0x8e   : > { %p4457_p11 = scmp.ne.s32.totalorder %s4840_s16, %s4456_s12  ;;  %p4461_p10 = scmp.lt.u32.totalorder %s4840_s16, %s5652_s3 }
  0x8f   : > { %p4462_p12 = scmp.lt.u32.totalorder %s4460_s18, %s4456_s12  ;;  %p4464_p13 = scmp.lt.u32.totalorder %s4456_s12, %s4840_s16 }
  0x90   : > { %p4458_p5 = pnand %p4457_p11, %p3318_p4 }
  0x91   : > { %p4463_p6 = por %p4462_p12, %p4461_p10 }
  0x92   : > { %p4459_p9 = pneg %p4458_p5 }
  0x93   : > { %p4465_p1 = por %p4464_p13, %p4463_p6 }
  0x95   : > { %p4466_p3 = pnand %p4465_p1, %p4459_p9 }
  0x97   : > { %4469 = shalt.err (!%p4466_p3)
}
  0x98   : > { %s4470_s19 = scalar_lea.vmem %s4842_s11, %s4829_s23  ;;  %s4601_s20 = smov [#allocation8]  }
  0x99   : > { %p4471_p8 = scmp.ne.s32.totalorder %s4842_s11, %s4470_s19  ;;  %s4474_s28 = sshll.u32 %s4601_s20, 4  ;;  %s4475_s28 = int_to_ptr.vmem [resolvable:$false] %s4474_s28 }
  0x9a   : > { %s4476_s10 = scalar_lea.vmem %s4475_s28, 16384  ;;  %p4477_p11 = scmp.lt.s32.totalorder %s4842_s11, %s4475_s28 }
  0x9b   : > { %p4472_p0 = pnand %p4471_p8, %p3318_p4  ;;  %p4478_p5 = scmp.lt.s32.totalorder %s4476_s10, %s4470_s19 }
  0x9d   : > { %p4473_p2 = pneg %p4472_p0  ;;  %p4479_p10 = por %p4478_p5, %p4477_p11 }
  0x9f   : > { %p4480_p12 = pnand %p4479_p10, %p4473_p2 }
  0xa1   : > { %4483 = shalt.err (!%p4480_p12)
}
  0xa2   : > { %s4602_s7 = smov 128   ;;  %s4603_s13 = smov 8  }
  0xa3   : > { %326 = dma.hbm_to_vmem [thread:$0]  (%p3318_p4), %s4840_s16, %s4829_s23, %s4842_s11, %s4832_s29, %s4602_s7, %s4602_s7, %s4603_s13  }
  0xa4 PF: > { %p3322_p9 = scmp.ge.s32.totalorder %s4558_s26, 1  ;;  %p328_p6 = scmp.lt.s32.totalorder %s4558_s26, 6 }
  0xa6   : > { %p329_p13 = pnand %p3322_p9, %p328_p6 }
  0xa7   : > { %s4872_s14 = sand.u32 (!%p329_p13), 1, %s4550_s24  }
  0xa8   : > { %332 = sbr.rel (%p329_p13) target bundleno = 777 (0x309), region = 44  ;;  %s3323_s12 = sshll.u32 (!%p329_p13), %s4872_s14, 9 }
  0xa9   : > { %s335_s15 = scalar_lea.sflag (!%p329_p13), [#allocation4], %s4872_s14  ;;  %s4876_s17 = scalar_lea.vmem (!%p329_p13), [#allocation3], %s3323_s12 }
  0xaf   : > { %4533 = dma.done.wait (%p4682_p7), %s335_s15, 8192  }
  0xb0   : > { %4535 = vsyncadd (%p4682_p7), %s335_s15, 4294959104  ;;  %s343_s26 = sand.u32 1, %s4661_s5   ;;  %s4883_s29 = scalar_lea.vmem [#allocation5], %s3323_s12 }
  0xb1   : > { %s344_s23 = scalar_lea.sflag [#allocation6], %s343_s26 }
  0xb2   : > { %4537 = dma.done.wait (%p4682_p7), %s344_s23, 16384  }
  0xb3   : > { %4539 = vsyncadd (%p4682_p7), %s344_s23, 4294950912  ;;  %s4889_s16 = scalar_lea.vmem [#allocation7], %s3323_s12  ;;  %s362_s11 = scalar_lea.sflag [#allocation9], %s4872_s14 }
  0xb4   : > { %s4892_s18 = scalar_lea.vmem [#allocation8], %s3323_s12 }
  0xb5   : > { %4541 = dma.done.wait (%p4682_p7), %s362_s11, 8192  }
  0xb6   : > { %4543 = vsyncadd (%p4682_p7), %s362_s11, 4294959104  ;;  %v4340_v0 = vld [vmem:[%s5653_s4 + $0x40] sm:$0xff]   ;;  %v4342_v2 = vld [vmem:[%s5653_s4 + $0x48] sm:$0xff]   ;;  %vm2683_vm0 = vcmask 27648   ;;  %p5659_p7 = scmp.ne.s32.totalorder %s5658_s9, 0 }
  0xb7   : > { %v4341_v1 = vld [vmem:[%s5653_s4 + $0x80] sm:$0xff]   ;;  %3720 = vmatprep.subr.bf16.mxu1 %v4340_v0  ;;  %v4343_v3 = vld [vmem:[%s5653_s4 + $0x88] sm:$0xff]   ;;  %v4344_v4 = vld [vmem:[%s5653_s4 + $0x50] sm:$0xff]  }
  0xb8   : > { %3880 = vmatprep.subr.bf16.mxu0 %v4341_v1  ;;  %3721 = vmatpush3.bf16.msra.mxu1 %v4340_v0  ;;  %v4345_v5 = vld [vmem:[%s5653_s4 + $0x90] sm:$0xff]   ;;  %v4346_v6 = vld [vmem:[%s5653_s4 + $0x58] sm:$0xff]   ;;  %v4348_v8 = vld [vmem:[%s5653_s4 + $0x60] sm:$0xff]  }
  0xb9   : > { %3881 = vmatpush3.bf16.msra.mxu0 %v4341_v1  ;;  %3722 = vmatprep.subr.bf16.mxu1 %v4342_v2  ;;  %v4347_v7 = vld [vmem:[%s5653_s4 + $0x98] sm:$0xff]   ;;  %v4349_v9 = vld [vmem:[%s5653_s4 + $0xa0] sm:$0xff]   ;;  %v4350_v10 = vld [vmem:[%s5653_s4 + $0x68] sm:$0xff]  }
  0xba   : > { %3882 = vmatprep.subr.bf16.mxu0 %v4343_v3  ;;  %v530_v11 = vld [vmem:[%s4883_s29] sm:$0xff]  ;;  %v531_v12 = vld [vmem:[%s4883_s29 + $0x8] sm:$0xff]  ;;  %v4352_v18 = vld [vmem:[%s5653_s4 + $0x70] sm:$0xff]  }
  0xbb   : > { %v626_v13 = vld [vmem:[%s4889_s16] sm:$0xff]  ;;  %v4351_v14 = vld [vmem:[%s5653_s4 + $0xa8] sm:$0xff]   ;;  %v594_v15 = vpack.c.bf16 %v531_v12, %v530_v11  ;;  %v4353_v19 = vld [vmem:[%s5653_s4 + $0xb0] sm:$0xff]  }
  0xbc   : > { %3723 = vmatpush3.bf16.msra.mxu1 %v4342_v2  ;;  %v627_v16 = vld [vmem:[%s4889_s16 + $0x8] sm:$0xff]  ;;  %v4354_v20 = vld [vmem:[%s5653_s4 + $0x78] sm:$0xff]   ;;  %v532_v22 = vld [vmem:[%s4883_s29 + $0x10] sm:$0xff] }
  0xbd   : > { %3883 = vmatpush3.bf16.msra.mxu0 %v4343_v3  ;;  %3724 = vmatprep.subr.bf16.mxu1 %v4344_v4  ;;  %v690_v17 = vpack.c.bf16 %v627_v16, %v626_v13  ;;  %v4355_v21 = vld [vmem:[%s5653_s4 + $0xb8] sm:$0xff]   ;;  %v4356_v24 = vld [vmem:[%s5653_s4] sm:$0xff]   ;;  %v628_v25 = vld [vmem:[%s4889_s16 + $0x10] sm:$0xff] }
  0xbe   : > { %3884 = vmatprep.subr.bf16.mxu0 %v4345_v5  ;;  %3736 = vmatprep.mubr.bf16.mxu1 %v594_v15  ;;  %v533_v23 = vld [vmem:[%s4883_s29 + $0x18] sm:$0xff]  ;;  %v4357_v27 = vld [vmem:[%s5653_s4 + $0xc0] sm:$0xff]   ;;  %v535_v29 = vld [vmem:[%s4883_s29 + $0x28] sm:$0xff] }
  0xbf   : > { %3896 = vmatprep.mubr.bf16.mxu0 %v690_v17  ;;  %v629_v26 = vld [vmem:[%s4889_s16 + $0x18] sm:$0xff]  ;;  %v534_v28 = vld [vmem:[%s4883_s29 + $0x20] sm:$0xff]  ;;  %v595_v30 = vpack.c.bf16 %v533_v23, %v532_v22  ;;  %v631_v32 = vld [vmem:[%s4889_s16 + $0x28] sm:$0xff] }
  0xc0   : > { %3725 = vmatpush3.bf16.msra.mxu1 %v4344_v4  ;;  %v630_v31 = vld [vmem:[%s4889_s16 + $0x20] sm:$0xff]  ;;  %v691_v33 = vpack.c.bf16 %v629_v26, %v628_v25  ;;  %v596_v34 = vpack.c.bf16 %v535_v29, %v534_v28  ;;  %v536_v36 = vld [vmem:[%s4883_s29 + $0x30] sm:$0xff]  ;;  %v4358_v37 = vld [vmem:[%s5653_s4 + $0x8] sm:$0xff]  }
  0xc1   : > { %3885 = vmatpush3.bf16.msra.mxu0 %v4345_v5  ;;  %3726 = vmatprep.subr.bf16.mxu1 %v4346_v6  ;;  %v692_v35 = vpack.c.bf16 %v631_v32, %v630_v31  ;;  %v4359_v38 = vld [vmem:[%s5653_s4 + $0xc8] sm:$0xff]   ;;  %v537_v39 = vld [vmem:[%s4883_s29 + $0x38] sm:$0xff]  ;;  %v632_v40 = vld [vmem:[%s4889_s16 + $0x30] sm:$0xff] }
  0xc2   : > { %3886 = vmatprep.subr.bf16.mxu0 %v4347_v7  ;;  %v633_v41 = vld [vmem:[%s4889_s16 + $0x38] sm:$0xff]  ;;  %v538_v42 = vld [vmem:[%s4883_s29 + $0x40] sm:$0xff]  ;;  %v539_v43 = vld [vmem:[%s4883_s29 + $0x48] sm:$0xff]  ;;  %v597_v48 = vpack.c.bf16 %v537_v39, %v536_v36 }
  0xc3   : > { %v4360_v44 = vld [vmem:[%s5653_s4 + $0x10] sm:$0xff]   ;;  %v634_v45 = vld [vmem:[%s4889_s16 + $0x40] sm:$0xff]  ;;  %v635_v46 = vld [vmem:[%s4889_s16 + $0x48] sm:$0xff]  ;;  %v693_v49 = vpack.c.bf16 %v633_v41, %v632_v40  ;;  %v598_v50 = vpack.c.bf16 %v539_v43, %v538_v42 }
  0xc4   : > { %3727 = vmatpush3.bf16.msra.mxu1 %v4346_v6  ;;  %v4361_v47 = vld [vmem:[%s5653_s4 + $0xd0] sm:$0xff]   ;;  %v694_v51 = vpack.c.bf16 %v635_v46, %v634_v45  ;;  %v4362_v52 = vld [vmem:[%s5653_s4 + $0x18] sm:$0xff]   ;;  %v542_v58 = vld [vmem:[%s4883_s29 + $0x60] sm:$0xff] }
  0xc5   : > { %3887 = vmatpush3.bf16.msra.mxu0 %v4347_v7  ;;  %3728 = vmatprep.subr.bf16.mxu1 %v4348_v8  ;;  %v4363_v53 = vld [vmem:[%s5653_s4 + $0xd8] sm:$0xff]   ;;  %v540_v54 = vld [vmem:[%s4883_s29 + $0x50] sm:$0xff]  ;;  %v543_v59 = vld [vmem:[%s4883_s29 + $0x68] sm:$0xff] }
  0xc6   : > { %3888 = vmatprep.subr.bf16.mxu0 %v4349_v9  ;;  %v541_v55 = vld [vmem:[%s4883_s29 + $0x58] sm:$0xff]  ;;  %v636_v56 = vld [vmem:[%s4889_s16 + $0x50] sm:$0xff]  ;;  %v638_v60 = vld [vmem:[%s4889_s16 + $0x60] sm:$0xff]  ;;  %v600_v0 = vpack.c.bf16 %v543_v59, %v542_v58 }
  0xc7   : > { %v637_v57 = vld [vmem:[%s4889_s16 + $0x58] sm:$0xff]  ;;  %v639_v61 = vld [vmem:[%s4889_s16 + $0x68] sm:$0xff]  ;;  %v599_v62 = vpack.c.bf16 %v541_v55, %v540_v54  ;;  %v4364_v2 = vld [vmem:[%s5653_s4 + $0x20] sm:$0xff]  }
  0xc8   : > { %3729 = vmatpush3.bf16.msra.mxu1 %v4348_v8  ;;  %v695_v63 = vpack.c.bf16 %v637_v57, %v636_v56  ;;  %v696_v1 = vpack.c.bf16 %v639_v61, %v638_v60  ;;  %v4365_v3 = vld [vmem:[%s5653_s4 + $0xe0] sm:$0xff]   ;;  %v544_v4 = vld [vmem:[%s4883_s29 + $0x70] sm:$0xff]  ;;  %v545_v5 = vld [vmem:[%s4883_s29 + $0x78] sm:$0xff] }
  0xc9   : > { %3889 = vmatpush3.bf16.msra.mxu0 %v4349_v9  ;;  %3730 = vmatprep.subr.bf16.mxu1 %v4350_v10  ;;  %v640_v6 = vld [vmem:[%s4889_s16 + $0x70] sm:$0xff]  ;;  %v641_v7 = vld [vmem:[%s4889_s16 + $0x78] sm:$0xff]  ;;  %v546_v8 = vld [vmem:[%s4883_s29 + $0x80] sm:$0xff]  ;;  %v601_v12 = vpack.c.bf16 %v545_v5, %v544_v4 }
  0xca   : > { %3890 = vmatprep.subr.bf16.mxu0 %v4351_v14  ;;  %v547_v9 = vld [vmem:[%s4883_s29 + $0x88] sm:$0xff]  ;;  %v697_v13 = vpack.c.bf16 %v641_v7, %v640_v6  ;;  %v550_v22 = vld [vmem:[%s4883_s29 + $0xa0] sm:$0xff]  ;;  %v4369_v31 = vld [vmem:[%s5653_s4 + $0xf0] sm:$0xff]  }
  0xcb   : > { %v643_v11 = vld [vmem:[%s4889_s16 + $0x88] sm:$0xff]  ;;  %v552_v32 = vld [vmem:[%s4883_s29 + $0xb0] sm:$0xff]  ;;  %v554_v36 = vld [vmem:[%s4883_s29 + $0xc0] sm:$0xff] }
  0xcc   : > { %3731 = vmatpush3.bf16.msra.mxu1 %v4350_v10  ;;  %v642_v10 = vld [vmem:[%s4889_s16 + $0x80] sm:$0xff]  ;;  %v4366_v15 = vld [vmem:[%s5653_s4 + $0x28] sm:$0xff]   ;;  %v4370_v41 = vld [vmem:[%s5653_s4 + $0x38] sm:$0xff]  }
  0xcd   : > { %3891 = vmatpush3.bf16.msra.mxu0 %v4351_v14  ;;  %3732 = vmatprep.subr.bf16.mxu1 %v4352_v18  ;;  %v602_v14 = vpack.c.bf16 %v547_v9, %v546_v8  ;;  %v698_v16 = vpack.c.bf16 %v643_v11, %v642_v10  ;;  %v4367_v17 = vld [vmem:[%s5653_s4 + $0xe8] sm:$0xff]   ;;  %v556_v46 = vld [vmem:[%s4883_s29 + $0xd0] sm:$0xff]  ;;  %v561_v59 = vld [vmem:[%s4883_s29 + $0xf8] sm:$0xff] }
  0xce   : > { %3892 = vmatprep.subr.bf16.mxu0 %v4353_v19  ;;  %v551_v23 = vld [vmem:[%s4883_s29 + $0xa8] sm:$0xff]  ;;  %v560_v58 = vld [vmem:[%s4883_s29 + $0xf0] sm:$0xff]  ;;  %v657_v61 = vld [vmem:[%s4889_s16 + $0xf8] sm:$0xff] }
  0xcf   : > { %v647_v25 = vld [vmem:[%s4889_s16 + $0xa8] sm:$0xff]  ;;  %v604_v29 = vpack.c.bf16 %v551_v23, %v550_v22  ;;  %v656_v60 = vld [vmem:[%s4889_s16 + $0xf0] sm:$0xff]  ;;  %v565_v7 = vld [vmem:[%s4883_s29 + $0x118] sm:$0xff] }
  0xd0   : > { %3733 = vmatpush3.bf16.msra.mxu1 %v4352_v18  ;;  %v548_v18 = vld [vmem:[%s4883_s29 + $0x90] sm:$0xff]  ;;  %v651_v39 = vld [vmem:[%s4889_s16 + $0xc8] sm:$0xff]  ;;  %v661_v9 = vld [vmem:[%s4889_s16 + $0x118] sm:$0xff] }
  0xd1   : > { %3893 = vmatpush3.bf16.msra.mxu0 %v4353_v19  ;;  %3734 = vmatprep.subr.bf16.mxu1 %v4354_v20  ;;  %v549_v19 = vld [vmem:[%s4883_s29 + $0x98] sm:$0xff]  ;;  %v564_v6 = vld [vmem:[%s4883_s29 + $0x110] sm:$0xff]  ;;  %v566_v10 = vld [vmem:[%s4883_s29 + $0x120] sm:$0xff] }
  0xd2   : > { %3894 = vmatprep.subr.bf16.mxu0 %v4355_v21  ;;  %v603_v26 = vpack.c.bf16 %v549_v19, %v548_v18  ;;  %v660_v8 = vld [vmem:[%s4889_s16 + $0x110] sm:$0xff]  ;;  %v567_v11 = vld [vmem:[%s4883_s29 + $0x128] sm:$0xff]  ;;  %v569_v19 = vld [vmem:[%s4883_s29 + $0x138] sm:$0xff] }
  0xd3   : > { %v568_v18 = vld [vmem:[%s4883_s29 + $0x130] sm:$0xff]  ;;  %v570_v22 = vld [vmem:[%s4883_s29 + $0x140] sm:$0xff]  ;;  %v571_v23 = vld [vmem:[%s4883_s29 + $0x148] sm:$0xff] }
  0xd4   : > { %3735 = vmatpush3.bf16.msra.mxu1 %v4354_v20  ;;  %v644_v20 = vld [vmem:[%s4889_s16 + $0x90] sm:$0xff] }
  0xd5   : > { %3895 = vmatpush3.bf16.msra.mxu0 %v4355_v21  ;;  %3800 = vmatprep.subr.bf16.mxu1 %v4356_v24  ;;  %v645_v21 = vld [vmem:[%s4889_s16 + $0x98] sm:$0xff] }
  0xd6   : > { %3960 = vmatprep.subr.bf16.mxu0 %v4357_v27  ;;  %v699_v28 = vpack.c.bf16 %v645_v21, %v644_v20  ;;  %v664_v20 = vld [vmem:[%s4889_s16 + $0x130] sm:$0xff]  ;;  %v665_v21 = vld [vmem:[%s4889_s16 + $0x138] sm:$0xff] }
  0xd7   : > { %3737 = vmatmul.mubr.bf16.vlgmr.msra.gmra.mrb[0].mxu1 %v595_v30 }
  0xd8   : > { %3897 = vmatmul.mubr.bf16.vlgmr.msra.gmra.mrb[0].mxu0 %v691_v33  ;;  %3801 = vmatpush3.bf16.msra.mxu1 %v4356_v24  ;;  %v646_v24 = vld [vmem:[%s4889_s16 + $0xa0] sm:$0xff]  ;;  %v553_v33 = vld [vmem:[%s4883_s29 + $0xb8] sm:$0xff] }
  0xd9   : > { %3961 = vmatpush3.bf16.msra.mxu0 %v4357_v27  ;;  %3740 = vmatprep.mubr.bf16.mxu1 %v596_v34  ;;  %v4368_v27 = vld [vmem:[%s5653_s4 + $0x30] sm:$0xff]   ;;  %v700_v30 = vpack.c.bf16 %v647_v25, %v646_v24  ;;  %v605_v40 = vpack.c.bf16 %v553_v33, %v552_v32  ;;  %v666_v24 = vld [vmem:[%s4889_s16 + $0x140] sm:$0xff]  ;;  %v667_v25 = vld [vmem:[%s4889_s16 + $0x148] sm:$0xff] }
  0xda   : > { %3900 = vmatprep.mubr.bf16.mxu0 %v692_v35  ;;  %3802 = vmatprep.subr.bf16.mxu1 %v4358_v37  ;;  %v648_v34 = vld [vmem:[%s4889_s16 + $0xb0] sm:$0xff]  ;;  %v649_v35 = vld [vmem:[%s4889_s16 + $0xb8] sm:$0xff] }
  0xdb   : > { %3962 = vmatprep.subr.bf16.mxu0 %v4359_v38  ;;  %v701_v42 = vpack.c.bf16 %v649_v35, %v648_v34  ;;  %v668_v32 = vld [vmem:[%s4889_s16 + $0x150] sm:$0xff]  ;;  %v669_v33 = vld [vmem:[%s4889_s16 + $0x158] sm:$0xff]  ;;  %v574_v34 = vld [vmem:[%s4883_s29 + $0x160] sm:$0xff] }
  0xdc   : > { %3803 = vmatpush3.bf16.msra.mxu1 %v4358_v37  ;;  %v555_v37 = vld [vmem:[%s4883_s29 + $0xc8] sm:$0xff] }
  0xdd   : > { %3963 = vmatpush3.bf16.msra.mxu0 %v4359_v38  ;;  %3804 = vmatprep.subr.bf16.mxu1 %v4360_v44  ;;  %v650_v38 = vld [vmem:[%s4889_s16 + $0xc0] sm:$0xff]  ;;  %v606_v43 = vpack.c.bf16 %v555_v37, %v554_v36  ;;  %v575_v35 = vld [vmem:[%s4883_s29 + $0x168] sm:$0xff] }
  0xde   : > { %3964 = vmatprep.subr.bf16.mxu0 %v4361_v47  ;;  %v702_v45 = vpack.c.bf16 %v651_v39, %v650_v38  ;;  %v670_v36 = vld [vmem:[%s4889_s16 + $0x160] sm:$0xff]  ;;  %v671_v37 = vld [vmem:[%s4889_s16 + $0x168] sm:$0xff]  ;;  %v711_v39 = vpack.c.bf16 %v669_v33, %v668_v32 }
  0xdf   : > { %3741 = vmatmul.mubr.bf16.gmra.mrb[4].mxu1 %v597_v48  ;;  %v652_v48 = vld [vmem:[%s4889_s16 + $0xd0] sm:$0xff]  ;;  %v722_v32 = vld [vmem:[%s4892_s18] sm:$0xff]  ;;  %v723_v33 = vld [vmem:[%s4892_s18 + $0x8] sm:$0xff] }
  0xe0   : > { %3901 = vmatmul.mubr.bf16.gmra.mrb[4].mxu0 %v693_v49  ;;  %3744 = vmatprep.mubr.bf16.mxu1 %v598_v50  ;;  %v653_v49 = vld [vmem:[%s4889_s16 + $0xd8] sm:$0xff]  ;;  %v558_v50 = vld [vmem:[%s4883_s29 + $0xe0] sm:$0xff] }
  0xe1   : > { %3904 = vmatprep.mubr.bf16.mxu0 %v694_v51  ;;  %3805 = vmatpush3.bf16.msra.mxu1 %v4360_v44  ;;  %v4371_v44 = vld [vmem:[%s5653_s4 + $0xf8] sm:$0xff]   ;;  %v559_v51 = vld [vmem:[%s4883_s29 + $0xe8] sm:$0xff]  ;;  %v703_v55 = vpack.c.bf16 %v653_v49, %v652_v48  ;;  %v674_v48 = vld [vmem:[%s4889_s16 + $0x180] sm:$0xff] }
  0xe2   : > { %3965 = vmatpush3.bf16.msra.mxu0 %v4361_v47  ;;  %3806 = vmatprep.subr.bf16.mxu1 %v4362_v52  ;;  %v557_v47 = vld [vmem:[%s4883_s29 + $0xd8] sm:$0xff]  ;;  %v608_v56 = vpack.c.bf16 %v559_v51, %v558_v50  ;;  %v675_v49 = vld [vmem:[%s4889_s16 + $0x188] sm:$0xff] }
  0xe3   : > { %3966 = vmatprep.subr.bf16.mxu0 %v4363_v53  ;;  %v607_v54 = vpack.c.bf16 %v557_v47, %v556_v46  ;;  %v578_v46 = vld [vmem:[%s4883_s29 + $0x180] sm:$0xff]  ;;  %v579_v47 = vld [vmem:[%s4883_s29 + $0x188] sm:$0xff] }
  0xe5   : > { %3807 = vmatpush3.bf16.msra.mxu1 %v4362_v52  ;;  %v654_v52 = vld [vmem:[%s4889_s16 + $0xe0] sm:$0xff] }
  0xe6   : > { %3967 = vmatpush3.bf16.msra.mxu0 %v4363_v53  ;;  %3808 = vmatprep.subr.bf16.mxu1 %v4364_v2  ;;  %v655_v53 = vld [vmem:[%s4889_s16 + $0xe8] sm:$0xff] }
  0xe7   : > { %3745 = vmatmul.mubr.bf16.gmra.mrb[8].mxu1 %v599_v62  ;;  %3968 = vmatprep.subr.bf16.mxu0 %v4365_v3  ;;  %v704_v57 = vpack.c.bf16 %v655_v53, %v654_v52  ;;  %v562_v62 = vld [vmem:[%s4883_s29 + $0x100] sm:$0xff]  ;;  %v618_v52 = vpack.c.bf16 %v579_v47, %v578_v46  ;;  %v714_v53 = vpack.c.bf16 %v675_v49, %v674_v48 }
  0xe8   : > { %3905 = vmatmul.mubr.bf16.gmra.mrb[8].mxu0 %v695_v63  ;;  %3748 = vmatprep.mubr.bf16.mxu1 %v600_v0  ;;  %v563_v63 = vld [vmem:[%s4883_s29 + $0x108] sm:$0xff]  ;;  %v658_v0 = vld [vmem:[%s4889_s16 + $0x100] sm:$0xff] }
  0xe9   : > { %3908 = vmatprep.mubr.bf16.mxu0 %v696_v1  ;;  %3809 = vmatpush3.bf16.msra.mxu1 %v4364_v2  ;;  %v659_v1 = vld [vmem:[%s4889_s16 + $0x108] sm:$0xff]  ;;  %v609_v2 = vpack.c.bf16 %v561_v59, %v560_v58  ;;  %v610_v4 = vpack.c.bf16 %v563_v63, %v562_v62  ;;  %v582_v58 = vld [vmem:[%s4883_s29 + $0x1a0] sm:$0xff] }
  0xea   : > { %3969 = vmatpush3.bf16.msra.mxu0 %v4365_v3  ;;  %3810 = vmatprep.subr.bf16.mxu1 %v4366_v15  ;;  %v705_v3 = vpack.c.bf16 %v657_v61, %v656_v60  ;;  %v706_v5 = vpack.c.bf16 %v659_v1, %v658_v0  ;;  %v583_v59 = vld [vmem:[%s4883_s29 + $0x1a8] sm:$0xff]  ;;  %v678_v60 = vld [vmem:[%s4889_s16 + $0x1a0] sm:$0xff] }
  0xeb   : > { %3970 = vmatprep.subr.bf16.mxu0 %v4367_v17  ;;  %v679_v61 = vld [vmem:[%s4889_s16 + $0x1a8] sm:$0xff]  ;;  %v620_v0 = vpack.c.bf16 %v583_v59, %v582_v58 }
  0xec   : > { %v716_v1 = vpack.c.bf16 %v679_v61, %v678_v60 }
  0xed   : > { %3811 = vmatpush3.bf16.msra.mxu1 %v4366_v15  ;;  %v707_v15 = vpack.c.bf16 %v661_v9, %v660_v8  ;;  %v682_v8 = vld [vmem:[%s4889_s16 + $0x1c0] sm:$0xff]  ;;  %v683_v9 = vld [vmem:[%s4889_s16 + $0x1c8] sm:$0xff] }
  0xee   : > { %3971 = vmatpush3.bf16.msra.mxu0 %v4367_v17  ;;  %3812 = vmatprep.subr.bf16.mxu1 %v4368_v27 }
  0xef   : > { %3749 = vmatmul.mubr.bf16.gmra.mrb[12].mxu1 %v601_v12  ;;  %3972 = vmatprep.subr.bf16.mxu0 %v4369_v31  ;;  %v662_v12 = vld [vmem:[%s4889_s16 + $0x120] sm:$0xff] }
  0xf0   : > { %3909 = vmatmul.mubr.bf16.gmra.mrb[12].mxu0 %v697_v13  ;;  %3752 = vmatprep.mubr.bf16.mxu1 %v602_v14  ;;  %v663_v13 = vld [vmem:[%s4889_s16 + $0x128] sm:$0xff]  ;;  %v611_v14 = vpack.c.bf16 %v565_v7, %v564_v6  ;;  %v586_v6 = vld [vmem:[%s4883_s29 + $0x1c0] sm:$0xff] }
  0xf1   : > { %3912 = vmatprep.mubr.bf16.mxu0 %v698_v16  ;;  %3813 = vmatpush3.bf16.msra.mxu1 %v4368_v27  ;;  %v612_v16 = vpack.c.bf16 %v567_v11, %v566_v10  ;;  %v708_v17 = vpack.c.bf16 %v663_v13, %v662_v12  ;;  %v709_v27 = vpack.c.bf16 %v665_v21, %v664_v20  ;;  %v587_v7 = vld [vmem:[%s4883_s29 + $0x1c8] sm:$0xff]  ;;  %v686_v20 = vld [vmem:[%s4889_s16 + $0x1e0] sm:$0xff] }
  0xf2   : > { %3973 = vmatpush3.bf16.msra.mxu0 %v4369_v31  ;;  %3814 = vmatprep.subr.bf16.mxu1 %v4370_v41  ;;  %v573_v31 = vld [vmem:[%s4883_s29 + $0x158] sm:$0xff]  ;;  %v622_v12 = vpack.c.bf16 %v587_v7, %v586_v6  ;;  %v718_v13 = vpack.c.bf16 %v683_v9, %v682_v8  ;;  %v687_v21 = vld [vmem:[%s4889_s16 + $0x1e8] sm:$0xff] }
  0xf3   : > { %3974 = vmatprep.subr.bf16.mxu0 %v4371_v44 }
  0xf5   : > { %3815 = vmatpush3.bf16.msra.mxu1 %v4370_v41  ;;  %v712_v41 = vpack.c.bf16 %v671_v37, %v670_v36  ;;  %v786_v37 = vpack.c.bf16 %v723_v33, %v722_v32 }
  0xf6   : > { %3975 = vmatpush3.bf16.msra.mxu0 %v4371_v44  ;;  %v672_v44 = vld [vmem:[%s4889_s16 + $0x170] sm:$0xff] }
  0xf7   : > { %3753 = vmatmul.mubr.bf16.gmra.mrb[16].mxu1 %v603_v26  ;;  %v613_v26 = vpack.c.bf16 %v569_v19, %v568_v18  ;;  %v590_v18 = vld [vmem:[%s4883_s29 + $0x1e0] sm:$0xff]  ;;  %v591_v19 = vld [vmem:[%s4883_s29 + $0x1e8] sm:$0xff] }
  0xf8   : > { %3913 = vmatmul.mubr.bf16.gmra.mrb[16].mxu0 %v699_v28  ;;  %3756 = vmatprep.mubr.bf16.mxu1 %v604_v29  ;;  %v614_v28 = vpack.c.bf16 %v571_v23, %v570_v22  ;;  %v710_v29 = vpack.c.bf16 %v667_v25, %v666_v24  ;;  %v624_v24 = vpack.c.bf16 %v591_v19, %v590_v18 }
  0xf9   : > { %3916 = vmatprep.mubr.bf16.mxu0 %v700_v30  ;;  %v572_v30 = vld [vmem:[%s4883_s29 + $0x150] sm:$0xff]  ;;  %v720_v25 = vpack.c.bf16 %v687_v21, %v686_v20 }
  0xfa   : > { %v615_v38 = vpack.c.bf16 %v573_v31, %v572_v30  ;;  %v434_v30 = vld [vmem:[%s4876_s17] sm:$0xff]  ;;  %v435_v31 = vld [vmem:[%s4876_s17 + $0x8] sm:$0xff] }
  0xfb   : > { %v498_v36 = vpack.c.bf16 %v435_v31, %v434_v30 }
  0xff   : > { %3757 = vmatmul.mubr.bf16.gmra.mrb[20].mxu1 %v605_v40  ;;  %v616_v40 = vpack.c.bf16 %v575_v35, %v574_v34 }
 0x100   : > { %3917 = vmatmul.mubr.bf16.gmra.mrb[20].mxu0 %v701_v42  ;;  %3760 = vmatprep.mubr.bf16.mxu1 %v606_v43  ;;  %v576_v42 = vld [vmem:[%s4883_s29 + $0x170] sm:$0xff]  ;;  %v577_v43 = vld [vmem:[%s4883_s29 + $0x178] sm:$0xff] }
 0x101   : > { %3920 = vmatprep.mubr.bf16.mxu0 %v702_v45  ;;  %v673_v45 = vld [vmem:[%s4889_s16 + $0x178] sm:$0xff]  ;;  %v617_v50 = vpack.c.bf16 %v577_v43, %v576_v42  ;;  %v438_v42 = vld [vmem:[%s4876_s17 + $0x20] sm:$0xff]  ;;  %v439_v43 = vld [vmem:[%s4876_s17 + $0x28] sm:$0xff] }
 0x102   : > { %v713_v51 = vpack.c.bf16 %v673_v45, %v672_v44  ;;  %v726_v44 = vld [vmem:[%s4892_s18 + $0x20] sm:$0xff]  ;;  %v727_v45 = vld [vmem:[%s4892_s18 + $0x28] sm:$0xff]  ;;  %v500_v48 = vpack.c.bf16 %v439_v43, %v438_v42 }
 0x103   : > { %v788_v49 = vpack.c.bf16 %v727_v45, %v726_v44 }
 0x107   : > { %3761 = vmatmul.mubr.bf16.gmra.mrb[24].mxu1 %v607_v54  ;;  %v580_v54 = vld [vmem:[%s4883_s29 + $0x190] sm:$0xff] }
 0x108   : > { %3921 = vmatmul.mubr.bf16.gmra.mrb[24].mxu0 %v703_v55  ;;  %3764 = vmatprep.mubr.bf16.mxu1 %v608_v56  ;;  %v581_v55 = vld [vmem:[%s4883_s29 + $0x198] sm:$0xff]  ;;  %v676_v56 = vld [vmem:[%s4889_s16 + $0x190] sm:$0xff] }
 0x109   : > { %3924 = vmatprep.mubr.bf16.mxu0 %v704_v57  ;;  %v677_v57 = vld [vmem:[%s4889_s16 + $0x198] sm:$0xff]  ;;  %v619_v62 = vpack.c.bf16 %v581_v55, %v580_v54  ;;  %v442_v54 = vld [vmem:[%s4876_s17 + $0x40] sm:$0xff]  ;;  %v443_v55 = vld [vmem:[%s4876_s17 + $0x48] sm:$0xff] }
 0x10a   : > { %v715_v63 = vpack.c.bf16 %v677_v57, %v676_v56  ;;  %v730_v56 = vld [vmem:[%s4892_s18 + $0x40] sm:$0xff]  ;;  %v731_v57 = vld [vmem:[%s4892_s18 + $0x48] sm:$0xff]  ;;  %v502_v60 = vpack.c.bf16 %v443_v55, %v442_v54 }
 0x10b   : > { %v790_v61 = vpack.c.bf16 %v731_v57, %v730_v56 }
 0x10f   : > { %3765 = vmatmul.mubr.bf16.gmra.mrb[28].mxu1 %v609_v2  ;;  %v584_v2 = vld [vmem:[%s4883_s29 + $0x1b0] sm:$0xff] }
 0x110   : > { %3925 = vmatmul.mubr.bf16.gmra.mrb[28].mxu0 %v705_v3  ;;  %3768 = vmatprep.mubr.bf16.mxu1 %v610_v4  ;;  %v585_v3 = vld [vmem:[%s4883_s29 + $0x1b8] sm:$0xff]  ;;  %v680_v4 = vld [vmem:[%s4889_s16 + $0x1b0] sm:$0xff] }
 0x111   : > { %3928 = vmatprep.mubr.bf16.mxu0 %v706_v5  ;;  %v681_v5 = vld [vmem:[%s4889_s16 + $0x1b8] sm:$0xff]  ;;  %v621_v10 = vpack.c.bf16 %v585_v3, %v584_v2  ;;  %v446_v2 = vld [vmem:[%s4876_s17 + $0x60] sm:$0xff]  ;;  %v447_v3 = vld [vmem:[%s4876_s17 + $0x68] sm:$0xff] }
 0x112   : > { %v717_v11 = vpack.c.bf16 %v681_v5, %v680_v4  ;;  %v734_v4 = vld [vmem:[%s4892_s18 + $0x60] sm:$0xff]  ;;  %v735_v5 = vld [vmem:[%s4892_s18 + $0x68] sm:$0xff]  ;;  %v504_v8 = vpack.c.bf16 %v447_v3, %v446_v2 }
 0x113   : > { %v792_v9 = vpack.c.bf16 %v735_v5, %v734_v4 }
 0x117   : > { %3769 = vmatmul.mubr.bf16.gmra.mrb[32].mxu1 %v611_v14  ;;  %v588_v14 = vld [vmem:[%s4883_s29 + $0x1d0] sm:$0xff] }
 0x118   : > { %3929 = vmatmul.mubr.bf16.gmra.mrb[32].mxu0 %v707_v15  ;;  %3772 = vmatprep.mubr.bf16.mxu1 %v612_v16  ;;  %v589_v15 = vld [vmem:[%s4883_s29 + $0x1d8] sm:$0xff]  ;;  %v684_v16 = vld [vmem:[%s4889_s16 + $0x1d0] sm:$0xff] }
 0x119   : > { %3932 = vmatprep.mubr.bf16.mxu0 %v708_v17  ;;  %v685_v17 = vld [vmem:[%s4889_s16 + $0x1d8] sm:$0xff]  ;;  %v623_v22 = vpack.c.bf16 %v589_v15, %v588_v14  ;;  %v450_v14 = vld [vmem:[%s4876_s17 + $0x80] sm:$0xff]  ;;  %v451_v15 = vld [vmem:[%s4876_s17 + $0x88] sm:$0xff] }
 0x11a   : > { %v719_v23 = vpack.c.bf16 %v685_v17, %v684_v16  ;;  %v738_v16 = vld [vmem:[%s4892_s18 + $0x80] sm:$0xff]  ;;  %v739_v17 = vld [vmem:[%s4892_s18 + $0x88] sm:$0xff]  ;;  %v506_v20 = vpack.c.bf16 %v451_v15, %v450_v14 }
 0x11b   : > { %v794_v21 = vpack.c.bf16 %v739_v17, %v738_v16 }
 0x11f   : > { %3773 = vmatmul.mubr.bf16.gmra.mrb[36].mxu1 %v613_v26  ;;  %v592_v26 = vld [vmem:[%s4883_s29 + $0x1f0] sm:$0xff] }
 0x120   : > { %3933 = vmatmul.mubr.bf16.gmra.mrb[36].mxu0 %v709_v27  ;;  %3776 = vmatprep.mubr.bf16.mxu1 %v614_v28  ;;  %v593_v27 = vld [vmem:[%s4883_s29 + $0x1f8] sm:$0xff]  ;;  %v688_v28 = vld [vmem:[%s4889_s16 + $0x1f0] sm:$0xff]  ;;  %s2361_s29 = sld [smem:[#allocation2]] }
 0x121   : > { %3936 = vmatprep.mubr.bf16.mxu0 %v710_v29  ;;  %v689_v29 = vld [vmem:[%s4889_s16 + $0x1f8] sm:$0xff]  ;;  %v625_v34 = vpack.c.bf16 %v593_v27, %v592_v26  ;;  %v454_v26 = vld [vmem:[%s4876_s17 + $0xa0] sm:$0xff]  ;;  %v455_v27 = vld [vmem:[%s4876_s17 + $0xa8] sm:$0xff]  ;;  %s3327_s16 = sshll.u32 %s4872_s14, 8 }
 0x122   : > { %v721_v35 = vpack.c.bf16 %v689_v29, %v688_v28  ;;  %v742_v28 = vld [vmem:[%s4892_s18 + $0xa0] sm:$0xff]  ;;  %v743_v29 = vld [vmem:[%s4892_s18 + $0xa8] sm:$0xff]  ;;  %v508_v32 = vpack.c.bf16 %v455_v27, %v454_v26  ;;  %s5257_s14 = scalar_lea.vmem [#allocation10], %s3327_s16  }
 0x123   : > { %v796_v33 = vpack.c.bf16 %v743_v29, %v742_v28 }
 0x127   : > { %3777 = vmatmul.mubr.bf16.gmra.mrb[40].mxu1 %v615_v38  ;;  %v436_v38 = vld [vmem:[%s4876_s17 + $0x10] sm:$0xff] }
 0x128   : > { %3937 = vmatmul.mubr.bf16.gmra.mrb[40].mxu0 %v711_v39  ;;  %3780 = vmatprep.mubr.bf16.mxu1 %v616_v40  ;;  %v437_v39 = vld [vmem:[%s4876_s17 + $0x18] sm:$0xff]  ;;  %v724_v40 = vld [vmem:[%s4892_s18 + $0x10] sm:$0xff] }
 0x129   : > { %3940 = vmatprep.mubr.bf16.mxu0 %v712_v41  ;;  %v725_v41 = vld [vmem:[%s4892_s18 + $0x18] sm:$0xff]  ;;  %v499_v46 = vpack.c.bf16 %v437_v39, %v436_v38  ;;  %v458_v38 = vld [vmem:[%s4876_s17 + $0xc0] sm:$0xff]  ;;  %v459_v39 = vld [vmem:[%s4876_s17 + $0xc8] sm:$0xff] }
 0x12a   : > { %v787_v47 = vpack.c.bf16 %v725_v41, %v724_v40  ;;  %v746_v40 = vld [vmem:[%s4892_s18 + $0xc0] sm:$0xff]  ;;  %v747_v41 = vld [vmem:[%s4892_s18 + $0xc8] sm:$0xff]  ;;  %v510_v44 = vpack.c.bf16 %v459_v39, %v458_v38 }
 0x12b   : > { %v798_v45 = vpack.c.bf16 %v747_v41, %v746_v40 }
 0x12f   : > { %3781 = vmatmul.mubr.bf16.gmra.mrb[44].mxu1 %v617_v50  ;;  %v440_v50 = vld [vmem:[%s4876_s17 + $0x30] sm:$0xff] }
 0x130   : > { %3941 = vmatmul.mubr.bf16.gmra.mrb[44].mxu0 %v713_v51  ;;  %3784 = vmatprep.mubr.bf16.mxu1 %v618_v52  ;;  %v441_v51 = vld [vmem:[%s4876_s17 + $0x38] sm:$0xff]  ;;  %v728_v52 = vld [vmem:[%s4892_s18 + $0x30] sm:$0xff] }
 0x131   : > { %3944 = vmatprep.mubr.bf16.mxu0 %v714_v53  ;;  %v729_v53 = vld [vmem:[%s4892_s18 + $0x38] sm:$0xff]  ;;  %v501_v58 = vpack.c.bf16 %v441_v51, %v440_v50  ;;  %v462_v50 = vld [vmem:[%s4876_s17 + $0xe0] sm:$0xff]  ;;  %v463_v51 = vld [vmem:[%s4876_s17 + $0xe8] sm:$0xff] }
 0x132   : > { %v789_v59 = vpack.c.bf16 %v729_v53, %v728_v52  ;;  %v750_v52 = vld [vmem:[%s4892_s18 + $0xe0] sm:$0xff]  ;;  %v751_v53 = vld [vmem:[%s4892_s18 + $0xe8] sm:$0xff]  ;;  %v512_v56 = vpack.c.bf16 %v463_v51, %v462_v50 }
 0x133   : > { %v800_v57 = vpack.c.bf16 %v751_v53, %v750_v52 }
 0x137   : > { %3785 = vmatmul.mubr.bf16.gmra.mrb[48].mxu1 %v619_v62  ;;  %v444_v62 = vld [vmem:[%s4876_s17 + $0x50] sm:$0xff] }
 0x138   : > { %3945 = vmatmul.mubr.bf16.gmra.mrb[48].mxu0 %v715_v63  ;;  %3788 = vmatprep.mubr.bf16.mxu1 %v620_v0  ;;  %v445_v63 = vld [vmem:[%s4876_s17 + $0x58] sm:$0xff]  ;;  %v732_v0 = vld [vmem:[%s4892_s18 + $0x50] sm:$0xff] }
 0x139   : > { %3948 = vmatprep.mubr.bf16.mxu0 %v716_v1  ;;  %v733_v1 = vld [vmem:[%s4892_s18 + $0x58] sm:$0xff]  ;;  %v503_v6 = vpack.c.bf16 %v445_v63, %v444_v62  ;;  %v466_v62 = vld [vmem:[%s4876_s17 + $0x100] sm:$0xff]  ;;  %v467_v63 = vld [vmem:[%s4876_s17 + $0x108] sm:$0xff] }
 0x13a   : > { %v791_v7 = vpack.c.bf16 %v733_v1, %v732_v0  ;;  %v754_v0 = vld [vmem:[%s4892_s18 + $0x100] sm:$0xff]  ;;  %v755_v1 = vld [vmem:[%s4892_s18 + $0x108] sm:$0xff]  ;;  %v514_v4 = vpack.c.bf16 %v467_v63, %v466_v62 }
 0x13b   : > { %v802_v5 = vpack.c.bf16 %v755_v1, %v754_v0 }
 0x13f   : > { %3789 = vmatmul.mubr.bf16.gmra.mrb[52].mxu1 %v621_v10  ;;  %v448_v10 = vld [vmem:[%s4876_s17 + $0x70] sm:$0xff] }
 0x140   : > { %3949 = vmatmul.mubr.bf16.gmra.mrb[52].mxu0 %v717_v11  ;;  %3792 = vmatprep.mubr.bf16.mxu1 %v622_v12  ;;  %v449_v11 = vld [vmem:[%s4876_s17 + $0x78] sm:$0xff]  ;;  %v736_v12 = vld [vmem:[%s4892_s18 + $0x70] sm:$0xff] }
 0x141   : > { %3952 = vmatprep.mubr.bf16.mxu0 %v718_v13  ;;  %v737_v13 = vld [vmem:[%s4892_s18 + $0x78] sm:$0xff]  ;;  %v505_v18 = vpack.c.bf16 %v449_v11, %v448_v10  ;;  %v470_v10 = vld [vmem:[%s4876_s17 + $0x120] sm:$0xff]  ;;  %v471_v11 = vld [vmem:[%s4876_s17 + $0x128] sm:$0xff] }
 0x142   : > { %v793_v19 = vpack.c.bf16 %v737_v13, %v736_v12  ;;  %v758_v12 = vld [vmem:[%s4892_s18 + $0x120] sm:$0xff]  ;;  %v759_v13 = vld [vmem:[%s4892_s18 + $0x128] sm:$0xff]  ;;  %v516_v16 = vpack.c.bf16 %v471_v11, %v470_v10 }
 0x143   : > { %v804_v17 = vpack.c.bf16 %v759_v13, %v758_v12 }
 0x147   : > { %3793 = vmatmul.mubr.bf16.gmra.mrb[56].mxu1 %v623_v22  ;;  %v452_v22 = vld [vmem:[%s4876_s17 + $0x90] sm:$0xff] }
 0x148   : > { %3953 = vmatmul.mubr.bf16.gmra.mrb[56].mxu0 %v719_v23  ;;  %3796 = vmatprep.mubr.bf16.mxu1 %v624_v24  ;;  %v453_v23 = vld [vmem:[%s4876_s17 + $0x98] sm:$0xff]  ;;  %v740_v24 = vld [vmem:[%s4892_s18 + $0x90] sm:$0xff] }
 0x149   : > { %3956 = vmatprep.mubr.bf16.mxu0 %v720_v25  ;;  %v741_v25 = vld [vmem:[%s4892_s18 + $0x98] sm:$0xff]  ;;  %v507_v30 = vpack.c.bf16 %v453_v23, %v452_v22  ;;  %v474_v22 = vld [vmem:[%s4876_s17 + $0x140] sm:$0xff]  ;;  %v475_v23 = vld [vmem:[%s4876_s17 + $0x148] sm:$0xff] }
 0x14a   : > { %v795_v31 = vpack.c.bf16 %v741_v25, %v740_v24  ;;  %v762_v24 = vld [vmem:[%s4892_s18 + $0x140] sm:$0xff]  ;;  %v763_v25 = vld [vmem:[%s4892_s18 + $0x148] sm:$0xff]  ;;  %v518_v28 = vpack.c.bf16 %v475_v23, %v474_v22 }
 0x14b   : > { %v806_v29 = vpack.c.bf16 %v763_v25, %v762_v24 }
 0x14f   : > { %3797 = vmatmul.mubr.bf16.gmra.mrb[60].mxu1 %v625_v34  ;;  %v456_v34 = vld [vmem:[%s4876_s17 + $0xb0] sm:$0xff] }
 0x150   : > { %3957 = vmatmul.mubr.bf16.gmra.mrb[60].mxu0 %v721_v35  ;;  %3816 = vmatprep.mubr.bf16.mxu1 %v498_v36  ;;  %v457_v35 = vld [vmem:[%s4876_s17 + $0xb8] sm:$0xff]  ;;  %v744_v36 = vld [vmem:[%s4892_s18 + $0xb0] sm:$0xff] }
 0x151   : > { %3976 = vmatprep.mubr.bf16.mxu0 %v786_v37  ;;  %v745_v37 = vld [vmem:[%s4892_s18 + $0xb8] sm:$0xff]  ;;  %v509_v42 = vpack.c.bf16 %v457_v35, %v456_v34  ;;  %v478_v34 = vld [vmem:[%s4876_s17 + $0x160] sm:$0xff]  ;;  %v479_v35 = vld [vmem:[%s4876_s17 + $0x168] sm:$0xff] }
 0x152   : > { %v797_v43 = vpack.c.bf16 %v745_v37, %v744_v36  ;;  %v766_v36 = vld [vmem:[%s4892_s18 + $0x160] sm:$0xff]  ;;  %v767_v37 = vld [vmem:[%s4892_s18 + $0x168] sm:$0xff]  ;;  %v520_v40 = vpack.c.bf16 %v479_v35, %v478_v34  ;;  %v5250_v34 = vstv %s2361_s29 }
 0x153   : > { %v808_v41 = vpack.c.bf16 %v767_v37, %v766_v36 }
 0x157   : > { %3817 = vmatmul.mubr.bf16.vlgmr.msra.gmra.mrb[0].mxu1 %v499_v46  ;;  %v460_v46 = vld [vmem:[%s4876_s17 + $0xd0] sm:$0xff] }
 0x158   : > { %3977 = vmatmul.mubr.bf16.vlgmr.msra.gmra.mrb[0].mxu0 %v787_v47  ;;  %3820 = vmatprep.mubr.bf16.mxu1 %v500_v48  ;;  %v461_v47 = vld [vmem:[%s4876_s17 + $0xd8] sm:$0xff]  ;;  %v748_v48 = vld [vmem:[%s4892_s18 + $0xd0] sm:$0xff] }
 0x159   : > { %3980 = vmatprep.mubr.bf16.mxu0 %v788_v49  ;;  %v749_v49 = vld [vmem:[%s4892_s18 + $0xd8] sm:$0xff]  ;;  %v511_v54 = vpack.c.bf16 %v461_v47, %v460_v46  ;;  %v482_v46 = vld [vmem:[%s4876_s17 + $0x180] sm:$0xff]  ;;  %v483_v47 = vld [vmem:[%s4876_s17 + $0x188] sm:$0xff] }
 0x15a   : > { %v799_v55 = vpack.c.bf16 %v749_v49, %v748_v48  ;;  %v770_v48 = vld [vmem:[%s4892_s18 + $0x180] sm:$0xff]  ;;  %v771_v49 = vld [vmem:[%s4892_s18 + $0x188] sm:$0xff]  ;;  %v522_v52 = vpack.c.bf16 %v483_v47, %v482_v46 }
 0x15b   : > { %v810_v53 = vpack.c.bf16 %v771_v49, %v770_v48 }
 0x15f   : > { %3821 = vmatmul.mubr.bf16.gmra.mrb[4].mxu1 %v501_v58  ;;  %v464_v58 = vld [vmem:[%s4876_s17 + $0xf0] sm:$0xff] }
 0x160   : > { %3981 = vmatmul.mubr.bf16.gmra.mrb[4].mxu0 %v789_v59  ;;  %3824 = vmatprep.mubr.bf16.mxu1 %v502_v60  ;;  %v465_v59 = vld [vmem:[%s4876_s17 + $0xf8] sm:$0xff]  ;;  %v752_v60 = vld [vmem:[%s4892_s18 + $0xf0] sm:$0xff] }
 0x161   : > { %3984 = vmatprep.mubr.bf16.mxu0 %v790_v61  ;;  %v753_v61 = vld [vmem:[%s4892_s18 + $0xf8] sm:$0xff]  ;;  %v513_v2 = vpack.c.bf16 %v465_v59, %v464_v58  ;;  %v486_v58 = vld [vmem:[%s4876_s17 + $0x1a0] sm:$0xff]  ;;  %v487_v59 = vld [vmem:[%s4876_s17 + $0x1a8] sm:$0xff] }
 0x162   : > { %v801_v3 = vpack.c.bf16 %v753_v61, %v752_v60  ;;  %v774_v60 = vld [vmem:[%s4892_s18 + $0x1a0] sm:$0xff]  ;;  %v775_v61 = vld [vmem:[%s4892_s18 + $0x1a8] sm:$0xff]  ;;  %v524_v0 = vpack.c.bf16 %v487_v59, %v486_v58 }
 0x163   : > { %v812_v1 = vpack.c.bf16 %v775_v61, %v774_v60 }
 0x167   : > { %3825 = vmatmul.mubr.bf16.gmra.mrb[8].mxu1 %v503_v6  ;;  %v468_v6 = vld [vmem:[%s4876_s17 + $0x110] sm:$0xff] }
 0x168   : > { %3985 = vmatmul.mubr.bf16.gmra.mrb[8].mxu0 %v791_v7  ;;  %3828 = vmatprep.mubr.bf16.mxu1 %v504_v8  ;;  %v469_v7 = vld [vmem:[%s4876_s17 + $0x118] sm:$0xff]  ;;  %v756_v8 = vld [vmem:[%s4892_s18 + $0x110] sm:$0xff] }
 0x169   : > { %3988 = vmatprep.mubr.bf16.mxu0 %v792_v9  ;;  %v757_v9 = vld [vmem:[%s4892_s18 + $0x118] sm:$0xff]  ;;  %v515_v14 = vpack.c.bf16 %v469_v7, %v468_v6  ;;  %v490_v6 = vld [vmem:[%s4876_s17 + $0x1c0] sm:$0xff]  ;;  %v491_v7 = vld [vmem:[%s4876_s17 + $0x1c8] sm:$0xff] }
 0x16a   : > { %v803_v15 = vpack.c.bf16 %v757_v9, %v756_v8  ;;  %v778_v8 = vld [vmem:[%s4892_s18 + $0x1c0] sm:$0xff]  ;;  %v779_v9 = vld [vmem:[%s4892_s18 + $0x1c8] sm:$0xff]  ;;  %v526_v12 = vpack.c.bf16 %v491_v7, %v490_v6 }
 0x16b   : > { %v814_v13 = vpack.c.bf16 %v779_v9, %v778_v8 }
 0x16f   : > { %3829 = vmatmul.mubr.bf16.gmra.mrb[12].mxu1 %v505_v18  ;;  %v472_v18 = vld [vmem:[%s4876_s17 + $0x130] sm:$0xff] }
 0x170   : > { %3989 = vmatmul.mubr.bf16.gmra.mrb[12].mxu0 %v793_v19  ;;  %3832 = vmatprep.mubr.bf16.mxu1 %v506_v20  ;;  %v473_v19 = vld [vmem:[%s4876_s17 + $0x138] sm:$0xff]  ;;  %v760_v20 = vld [vmem:[%s4892_s18 + $0x130] sm:$0xff] }
 0x171   : > { %3992 = vmatprep.mubr.bf16.mxu0 %v794_v21  ;;  %v761_v21 = vld [vmem:[%s4892_s18 + $0x138] sm:$0xff]  ;;  %v517_v26 = vpack.c.bf16 %v473_v19, %v472_v18  ;;  %v494_v18 = vld [vmem:[%s4876_s17 + $0x1e0] sm:$0xff]  ;;  %v495_v19 = vld [vmem:[%s4876_s17 + $0x1e8] sm:$0xff] }
 0x172   : > { %v805_v27 = vpack.c.bf16 %v761_v21, %v760_v20  ;;  %v782_v20 = vld [vmem:[%s4892_s18 + $0x1e0] sm:$0xff]  ;;  %v783_v21 = vld [vmem:[%s4892_s18 + $0x1e8] sm:$0xff]  ;;  %v528_v24 = vpack.c.bf16 %v495_v19, %v494_v18 }
 0x173   : > { %v816_v25 = vpack.c.bf16 %v783_v21, %v782_v20 }
 0x177   : > { %3833 = vmatmul.mubr.bf16.gmra.mrb[16].mxu1 %v507_v30  ;;  %v476_v30 = vld [vmem:[%s4876_s17 + $0x150] sm:$0xff] }
 0x178   : > { %3993 = vmatmul.mubr.bf16.gmra.mrb[16].mxu0 %v795_v31  ;;  %3836 = vmatprep.mubr.bf16.mxu1 %v508_v32  ;;  %v477_v31 = vld [vmem:[%s4876_s17 + $0x158] sm:$0xff]  ;;  %v764_v32 = vld [vmem:[%s4892_s18 + $0x150] sm:$0xff] }
 0x179   : > { %3996 = vmatprep.mubr.bf16.mxu0 %v796_v33  ;;  %v765_v33 = vld [vmem:[%s4892_s18 + $0x158] sm:$0xff]  ;;  %v519_v38 = vpack.c.bf16 %v477_v31, %v476_v30 }
 0x17a   : > { %v807_v39 = vpack.c.bf16 %v765_v33, %v764_v32 }
 0x17f   : > { %3837 = vmatmul.mubr.bf16.gmra.mrb[20].mxu1 %v509_v42  ;;  %v480_v42 = vld [vmem:[%s4876_s17 + $0x170] sm:$0xff] }
 0x180   : > { %3997 = vmatmul.mubr.bf16.gmra.mrb[20].mxu0 %v797_v43  ;;  %3840 = vmatprep.mubr.bf16.mxu1 %v510_v44  ;;  %v481_v43 = vld [vmem:[%s4876_s17 + $0x178] sm:$0xff]  ;;  %v768_v44 = vld [vmem:[%s4892_s18 + $0x170] sm:$0xff] }
 0x181   : > { %4000 = vmatprep.mubr.bf16.mxu0 %v798_v45  ;;  %v769_v45 = vld [vmem:[%s4892_s18 + $0x178] sm:$0xff]  ;;  %v521_v50 = vpack.c.bf16 %v481_v43, %v480_v42 }
 0x182   : > { %v809_v51 = vpack.c.bf16 %v769_v45, %v768_v44 }
 0x187   : > { %3841 = vmatmul.mubr.bf16.gmra.mrb[24].mxu1 %v511_v54  ;;  %v484_v54 = vld [vmem:[%s4876_s17 + $0x190] sm:$0xff] }
 0x188   : > { %4001 = vmatmul.mubr.bf16.gmra.mrb[24].mxu0 %v799_v55  ;;  %3844 = vmatprep.mubr.bf16.mxu1 %v512_v56  ;;  %v485_v55 = vld [vmem:[%s4876_s17 + $0x198] sm:$0xff]  ;;  %v772_v56 = vld [vmem:[%s4892_s18 + $0x190] sm:$0xff] }
 0x189   : > { %4004 = vmatprep.mubr.bf16.mxu0 %v800_v57  ;;  %v773_v57 = vld [vmem:[%s4892_s18 + $0x198] sm:$0xff]  ;;  %v523_v62 = vpack.c.bf16 %v485_v55, %v484_v54 }
 0x18a   : > { %v811_v63 = vpack.c.bf16 %v773_v57, %v772_v56 }
 0x18f   : > { %3845 = vmatmul.mubr.bf16.gmra.mrb[28].mxu1 %v513_v2  ;;  %v488_v2 = vld [vmem:[%s4876_s17 + $0x1b0] sm:$0xff] }
 0x190   : > { %4005 = vmatmul.mubr.bf16.gmra.mrb[28].mxu0 %v801_v3  ;;  %3848 = vmatprep.mubr.bf16.mxu1 %v514_v4  ;;  %v489_v3 = vld [vmem:[%s4876_s17 + $0x1b8] sm:$0xff]  ;;  %v776_v4 = vld [vmem:[%s4892_s18 + $0x1b0] sm:$0xff] }
 0x191   : > { %4008 = vmatprep.mubr.bf16.mxu0 %v802_v5  ;;  %v777_v5 = vld [vmem:[%s4892_s18 + $0x1b8] sm:$0xff]  ;;  %v525_v10 = vpack.c.bf16 %v489_v3, %v488_v2 }
 0x192   : > { %v813_v11 = vpack.c.bf16 %v777_v5, %v776_v4 }
 0x197   : > { %3849 = vmatmul.mubr.bf16.gmra.mrb[32].mxu1 %v515_v14  ;;  %v492_v14 = vld [vmem:[%s4876_s17 + $0x1d0] sm:$0xff] }
 0x198   : > { %4009 = vmatmul.mubr.bf16.gmra.mrb[32].mxu0 %v803_v15  ;;  %3852 = vmatprep.mubr.bf16.mxu1 %v516_v16  ;;  %v493_v15 = vld [vmem:[%s4876_s17 + $0x1d8] sm:$0xff]  ;;  %v780_v16 = vld [vmem:[%s4892_s18 + $0x1d0] sm:$0xff] }
 0x199   : > { %4012 = vmatprep.mubr.bf16.mxu0 %v804_v17  ;;  %v781_v17 = vld [vmem:[%s4892_s18 + $0x1d8] sm:$0xff]  ;;  %v527_v22 = vpack.c.bf16 %v493_v15, %v492_v14 }
 0x19a   : > { %v815_v23 = vpack.c.bf16 %v781_v17, %v780_v16 }
 0x19f   : > { %3853 = vmatmul.mubr.bf16.gmra.mrb[36].mxu1 %v517_v26  ;;  %v496_v26 = vld [vmem:[%s4876_s17 + $0x1f0] sm:$0xff] }
 0x1a0   : > { %4013 = vmatmul.mubr.bf16.gmra.mrb[36].mxu0 %v805_v27  ;;  %3856 = vmatprep.mubr.bf16.mxu1 %v518_v28  ;;  %v497_v27 = vld [vmem:[%s4876_s17 + $0x1f8] sm:$0xff]  ;;  %v784_v28 = vld [vmem:[%s4892_s18 + $0x1f0] sm:$0xff]  ;;  %s3473_s17 = sshll.u32 (%p5659_p7), %s4661_s5, 6 }
 0x1a1   : > { %4016 = vmatprep.mubr.bf16.mxu0 %v806_v29  ;;  %v785_v29 = vld [vmem:[%s4892_s18 + $0x1f8] sm:$0xff]  ;;  %v529_v30 = vpack.c.bf16 %v497_v27, %v496_v26  ;;  %s3557_s18 = sshll.u32 (%p5659_p7), %s4661_s5, 8  ;;  %s2756_s8 = ssub.s32 (%p5659_p7), 258, %s3473_s17 }
 0x1a2   : > { %v817_v31 = vpack.c.bf16 %v785_v29, %v784_v28  ;;  %s5454_s26 = scalar_lea.vmem (%p5659_p7), %s5655_s6, %s3557_s18   ;;  %p2757_p4 = scmp.lt.s32.totalorder (%p5659_p7), %s2756_s8, 64 }
 0x1a7   : > { %3857 = vmatmul.mubr.bf16.gmra.mrb[40].mxu1 %v519_v38 }
 0x1a8   : > { %4017 = vmatmul.mubr.bf16.gmra.mrb[40].mxu0 %v807_v39  ;;  %3860 = vmatprep.mubr.bf16.mxu1 %v520_v40 }
 0x1a9   : > { %4020 = vmatprep.mubr.bf16.mxu0 %v808_v41 }
 0x1af   : > { %3861 = vmatmul.mubr.bf16.gmra.mrb[44].mxu1 %v521_v50 }
 0x1b0   : > { %4021 = vmatmul.mubr.bf16.gmra.mrb[44].mxu0 %v809_v51  ;;  %3864 = vmatprep.mubr.bf16.mxu1 %v522_v52 }
 0x1b1   : > { %4024 = vmatprep.mubr.bf16.mxu0 %v810_v53 }
 0x1b7   : > { %3865 = vmatmul.mubr.bf16.gmra.mrb[48].mxu1 %v523_v62 }
 0x1b8   : > { %4025 = vmatmul.mubr.bf16.gmra.mrb[48].mxu0 %v811_v63  ;;  %3868 = vmatprep.mubr.bf16.mxu1 %v524_v0 }
 0x1b9   : > { %4028 = vmatprep.mubr.bf16.mxu0 %v812_v1 }
 0x1bf   : > { %3869 = vmatmul.mubr.bf16.gmra.mrb[52].mxu1 %v525_v10 }
 0x1c0   : > { %4029 = vmatmul.mubr.bf16.gmra.mrb[52].mxu0 %v813_v11  ;;  %3872 = vmatprep.mubr.bf16.mxu1 %v526_v12 }
 0x1c1   : > { %4032 = vmatprep.mubr.bf16.mxu0 %v814_v13 }
 0x1c7   : > { %3873 = vmatmul.mubr.bf16.gmra.mrb[56].mxu1 %v527_v22 }
 0x1c8   : > { %4033 = vmatmul.mubr.bf16.gmra.mrb[56].mxu0 %v815_v23  ;;  %3876 = vmatprep.mubr.bf16.mxu1 %v528_v24 }
 0x1c9   : > { %4036 = vmatprep.mubr.bf16.mxu0 %v816_v25 }
 0x1cf   : > { %3877 = vmatmul.mubr.bf16.gmra.mrb[60].mxu1 %v529_v30 }
 0x1d0   : > { %4037 = vmatmul.mubr.bf16.gmra.mrb[60].mxu0 %v817_v31 }
 0x22a   : > { %v3818_v32 = vpop.f32.mrb[0].mxu1 }
 0x22b   : > { %v3978_v33 = vpop.f32.mrb[0].mxu0  ;;  %v1270_v35 = vpop.f32.mrb[1].mxu1 }
 0x22c   : > { %v4040_v36 = vadd.f32 %v3978_v33, %v3818_v32  ;;  %v2042_v37 = vpop.f32.mrb[1].mxu0  ;;  %v3819_v38 = vpop.f32.mrb[2].mxu1 }
 0x22d   : > { %v4041_v39 = vadd.f32 %v2042_v37, %v1270_v35  ;;  %v3979_v40 = vpop.f32.mrb[2].mxu0  ;;  %v1273_v41 = vpop.f32.mrb[3].mxu1 }
 0x22e   : > { %v2365_v42 = vadd.f32 %v4040_v36, %v5250_v34  ;;  %v4042_v43 = vadd.f32 %v3979_v40, %v3819_v38  ;;  %v2045_v44 = vpop.f32.mrb[3].mxu0 }
 0x22f   : > { %v2363_v45 = vadd.f32 %v4041_v39, %v5250_v34  ;;  %v4043_v46 = vadd.f32 %v2045_v44, %v1273_v41 }
 0x230   : > { %v3495_v47 = vpack.c.bf16 %v2365_v42, %v2365_v42  ;;  %v2366_v48 = vadd.f32 %v4042_v43, %v5250_v34 }
 0x231   : > { %v3493_v49 = vpack.c.bf16 %v2363_v45, %v2363_v45  ;;  %v2364_v50 = vadd.f32 %v4043_v46, %v5250_v34 }
 0x232   : > { %2686 = vst.msk [vmem:[%s5257_s14 + $0x8] sm:$0xf] %vm2683_vm0, %v3495_v47  ;;  %v3496_v51 = vpack.c.bf16 %v2366_v48, %v2366_v48  ;;  %v3822_v52 = vpop.f32.mrb[4].mxu1 }
 0x233   : > { %2684 = vst.msk [vmem:[%s5257_s14] sm:$0xf] %vm2683_vm0, %v3493_v49  ;;  %v3494_v53 = vpack.c.bf16 %v2364_v50, %v2364_v50  ;;  %v3982_v54 = vpop.f32.mrb[4].mxu0  ;;  %v1286_v55 = vpop.f32.mrb[5].mxu1 }
 0x234   : > { %2687 = vst.msk [vmem:[%s5257_s14 + $0xc] sm:$0xf] %vm2683_vm0, %v3496_v51  ;;  %v4044_v56 = vadd.f32 %v3982_v54, %v3822_v52  ;;  %v2058_v57 = vpop.f32.mrb[5].mxu0  ;;  %v3823_v58 = vpop.f32.mrb[6].mxu1 }
 0x235   : > { %2685 = vst.msk [vmem:[%s5257_s14 + $0x4] sm:$0xf] %vm2683_vm0, %v3494_v53  ;;  %v4045_v59 = vadd.f32 %v2058_v57, %v1286_v55  ;;  %v3983_v60 = vpop.f32.mrb[6].mxu0  ;;  %v1289_v61 = vpop.f32.mrb[7].mxu1 }
 0x236   : > { %v2369_v62 = vadd.f32 %v4044_v56, %v5250_v34  ;;  %v4046_v63 = vadd.f32 %v3983_v60, %v3823_v58  ;;  %v2061_v0 = vpop.f32.mrb[7].mxu0 }
 0x237   : > { %v2367_v1 = vadd.f32 %v4045_v59, %v5250_v34  ;;  %v4047_v2 = vadd.f32 %v2061_v0, %v1289_v61 }
 0x238   : > { %v3499_v3 = vpack.c.bf16 %v2369_v62, %v2369_v62  ;;  %v2370_v4 = vadd.f32 %v4046_v63, %v5250_v34 }
 0x239   : > { %v3497_v5 = vpack.c.bf16 %v2367_v1, %v2367_v1  ;;  %v2368_v6 = vadd.f32 %v4047_v2, %v5250_v34 }
 0x23a   : > { %2690 = vst.msk [vmem:[%s5257_s14 + $0x18] sm:$0xf] %vm2683_vm0, %v3499_v3  ;;  %v3500_v7 = vpack.c.bf16 %v2370_v4, %v2370_v4  ;;  %v3826_v8 = vpop.f32.mrb[8].mxu1 }
 0x23b   : > { %2688 = vst.msk [vmem:[%s5257_s14 + $0x10] sm:$0xf] %vm2683_vm0, %v3497_v5  ;;  %v3498_v9 = vpack.c.bf16 %v2368_v6, %v2368_v6  ;;  %v3986_v10 = vpop.f32.mrb[8].mxu0  ;;  %v1302_v11 = vpop.f32.mrb[9].mxu1 }
 0x23c   : > { %2691 = vst.msk [vmem:[%s5257_s14 + $0x1c] sm:$0xf] %vm2683_vm0, %v3500_v7  ;;  %v4048_v12 = vadd.f32 %v3986_v10, %v3826_v8  ;;  %v2074_v13 = vpop.f32.mrb[9].mxu0  ;;  %v3827_v14 = vpop.f32.mrb[10].mxu1 }
 0x23d   : > { %2689 = vst.msk [vmem:[%s5257_s14 + $0x14] sm:$0xf] %vm2683_vm0, %v3498_v9  ;;  %v4049_v15 = vadd.f32 %v2074_v13, %v1302_v11  ;;  %v3987_v16 = vpop.f32.mrb[10].mxu0  ;;  %v1305_v17 = vpop.f32.mrb[11].mxu1 }
 0x23e   : > { %v2373_v18 = vadd.f32 %v4048_v12, %v5250_v34  ;;  %v4050_v19 = vadd.f32 %v3987_v16, %v3827_v14  ;;  %v2077_v20 = vpop.f32.mrb[11].mxu0 }
 0x23f   : > { %v2371_v21 = vadd.f32 %v4049_v15, %v5250_v34  ;;  %v4051_v22 = vadd.f32 %v2077_v20, %v1305_v17 }
 0x240   : > { %v3503_v23 = vpack.c.bf16 %v2373_v18, %v2373_v18  ;;  %v2374_v24 = vadd.f32 %v4050_v19, %v5250_v34 }
 0x241   : > { %v3501_v25 = vpack.c.bf16 %v2371_v21, %v2371_v21  ;;  %v2372_v26 = vadd.f32 %v4051_v22, %v5250_v34 }
 0x242   : > { %2694 = vst.msk [vmem:[%s5257_s14 + $0x28] sm:$0xf] %vm2683_vm0, %v3503_v23  ;;  %v3504_v27 = vpack.c.bf16 %v2374_v24, %v2374_v24  ;;  %v3830_v28 = vpop.f32.mrb[12].mxu1 }
 0x243   : > { %2692 = vst.msk [vmem:[%s5257_s14 + $0x20] sm:$0xf] %vm2683_vm0, %v3501_v25  ;;  %v3502_v29 = vpack.c.bf16 %v2372_v26, %v2372_v26  ;;  %v3990_v30 = vpop.f32.mrb[12].mxu0  ;;  %v1318_v31 = vpop.f32.mrb[13].mxu1 }
 0x244   : > { %2695 = vst.msk [vmem:[%s5257_s14 + $0x2c] sm:$0xf] %vm2683_vm0, %v3504_v27  ;;  %v4052_v32 = vadd.f32 %v3990_v30, %v3830_v28  ;;  %v2090_v33 = vpop.f32.mrb[13].mxu0  ;;  %v3831_v35 = vpop.f32.mrb[14].mxu1 }
 0x245   : > { %2693 = vst.msk [vmem:[%s5257_s14 + $0x24] sm:$0xf] %vm2683_vm0, %v3502_v29  ;;  %v4053_v36 = vadd.f32 %v2090_v33, %v1318_v31  ;;  %v3991_v37 = vpop.f32.mrb[14].mxu0  ;;  %v1321_v38 = vpop.f32.mrb[15].mxu1 }
 0x246   : > { %v2377_v39 = vadd.f32 %v4052_v32, %v5250_v34  ;;  %v4054_v40 = vadd.f32 %v3991_v37, %v3831_v35  ;;  %v2093_v41 = vpop.f32.mrb[15].mxu0 }
 0x247   : > { %v2375_v42 = vadd.f32 %v4053_v36, %v5250_v34  ;;  %v4055_v43 = vadd.f32 %v2093_v41, %v1321_v38 }
 0x248   : > { %v3507_v44 = vpack.c.bf16 %v2377_v39, %v2377_v39  ;;  %v2378_v45 = vadd.f32 %v4054_v40, %v5250_v34 }
 0x249   : > { %v3505_v46 = vpack.c.bf16 %v2375_v42, %v2375_v42  ;;  %v2376_v47 = vadd.f32 %v4055_v43, %v5250_v34 }
 0x24a   : > { %2698 = vst.msk [vmem:[%s5257_s14 + $0x38] sm:$0xf] %vm2683_vm0, %v3507_v44  ;;  %v3508_v48 = vpack.c.bf16 %v2378_v45, %v2378_v45  ;;  %v3834_v49 = vpop.f32.mrb[16].mxu1 }
 0x24b   : > { %2696 = vst.msk [vmem:[%s5257_s14 + $0x30] sm:$0xf] %vm2683_vm0, %v3505_v46  ;;  %v3506_v50 = vpack.c.bf16 %v2376_v47, %v2376_v47  ;;  %v3994_v51 = vpop.f32.mrb[16].mxu0  ;;  %v1334_v52 = vpop.f32.mrb[17].mxu1 }
 0x24c   : > { %2699 = vst.msk [vmem:[%s5257_s14 + $0x3c] sm:$0xf] %vm2683_vm0, %v3508_v48  ;;  %v4056_v53 = vadd.f32 %v3994_v51, %v3834_v49  ;;  %v2106_v54 = vpop.f32.mrb[17].mxu0  ;;  %v3835_v55 = vpop.f32.mrb[18].mxu1 }
 0x24d   : > { %2697 = vst.msk [vmem:[%s5257_s14 + $0x34] sm:$0xf] %vm2683_vm0, %v3506_v50  ;;  %v4057_v56 = vadd.f32 %v2106_v54, %v1334_v52  ;;  %v3995_v57 = vpop.f32.mrb[18].mxu0  ;;  %v1337_v58 = vpop.f32.mrb[19].mxu1 }
 0x24e   : > { %v2381_v59 = vadd.f32 %v4056_v53, %v5250_v34  ;;  %v4058_v60 = vadd.f32 %v3995_v57, %v3835_v55  ;;  %v2109_v61 = vpop.f32.mrb[19].mxu0 }
 0x24f   : > { %v2379_v62 = vadd.f32 %v4057_v56, %v5250_v34  ;;  %v4059_v63 = vadd.f32 %v2109_v61, %v1337_v58 }
 0x250   : > { %v3511_v0 = vpack.c.bf16 %v2381_v59, %v2381_v59  ;;  %v2382_v1 = vadd.f32 %v4058_v60, %v5250_v34 }
 0x251   : > { %v3509_v2 = vpack.c.bf16 %v2379_v62, %v2379_v62  ;;  %v2380_v3 = vadd.f32 %v4059_v63, %v5250_v34 }
 0x252   : > { %2702 = vst.msk [vmem:[%s5257_s14 + $0x48] sm:$0xf] %vm2683_vm0, %v3511_v0  ;;  %v3512_v4 = vpack.c.bf16 %v2382_v1, %v2382_v1  ;;  %v3838_v5 = vpop.f32.mrb[20].mxu1 }
 0x253   : > { %2700 = vst.msk [vmem:[%s5257_s14 + $0x40] sm:$0xf] %vm2683_vm0, %v3509_v2  ;;  %v3510_v6 = vpack.c.bf16 %v2380_v3, %v2380_v3  ;;  %v3998_v7 = vpop.f32.mrb[20].mxu0  ;;  %v1350_v8 = vpop.f32.mrb[21].mxu1 }
 0x254   : > { %2703 = vst.msk [vmem:[%s5257_s14 + $0x4c] sm:$0xf] %vm2683_vm0, %v3512_v4  ;;  %v4060_v9 = vadd.f32 %v3998_v7, %v3838_v5  ;;  %v2122_v10 = vpop.f32.mrb[21].mxu0  ;;  %v3839_v11 = vpop.f32.mrb[22].mxu1 }
 0x255   : > { %2701 = vst.msk [vmem:[%s5257_s14 + $0x44] sm:$0xf] %vm2683_vm0, %v3510_v6  ;;  %v4061_v12 = vadd.f32 %v2122_v10, %v1350_v8  ;;  %v3999_v13 = vpop.f32.mrb[22].mxu0  ;;  %v1353_v14 = vpop.f32.mrb[23].mxu1 }
 0x256   : > { %v2385_v15 = vadd.f32 %v4060_v9, %v5250_v34  ;;  %v4062_v16 = vadd.f32 %v3999_v13, %v3839_v11  ;;  %v2125_v17 = vpop.f32.mrb[23].mxu0 }
 0x257   : > { %v2383_v18 = vadd.f32 %v4061_v12, %v5250_v34  ;;  %v4063_v19 = vadd.f32 %v2125_v17, %v1353_v14 }
 0x258   : > { %v3515_v20 = vpack.c.bf16 %v2385_v15, %v2385_v15  ;;  %v2386_v21 = vadd.f32 %v4062_v16, %v5250_v34 }
 0x259   : > { %v3513_v22 = vpack.c.bf16 %v2383_v18, %v2383_v18  ;;  %v2384_v23 = vadd.f32 %v4063_v19, %v5250_v34 }
 0x25a   : > { %2706 = vst.msk [vmem:[%s5257_s14 + $0x58] sm:$0xf] %vm2683_vm0, %v3515_v20  ;;  %v3516_v24 = vpack.c.bf16 %v2386_v21, %v2386_v21  ;;  %v3842_v25 = vpop.f32.mrb[24].mxu1 }
 0x25b   : > { %2704 = vst.msk [vmem:[%s5257_s14 + $0x50] sm:$0xf] %vm2683_vm0, %v3513_v22  ;;  %v3514_v26 = vpack.c.bf16 %v2384_v23, %v2384_v23  ;;  %v4002_v27 = vpop.f32.mrb[24].mxu0  ;;  %v1366_v28 = vpop.f32.mrb[25].mxu1 }
 0x25c   : > { %2707 = vst.msk [vmem:[%s5257_s14 + $0x5c] sm:$0xf] %vm2683_vm0, %v3516_v24  ;;  %v4064_v29 = vadd.f32 %v4002_v27, %v3842_v25  ;;  %v2138_v30 = vpop.f32.mrb[25].mxu0  ;;  %v3843_v31 = vpop.f32.mrb[26].mxu1 }
 0x25d   : > { %2705 = vst.msk [vmem:[%s5257_s14 + $0x54] sm:$0xf] %vm2683_vm0, %v3514_v26  ;;  %v4065_v32 = vadd.f32 %v2138_v30, %v1366_v28  ;;  %v4003_v33 = vpop.f32.mrb[26].mxu0  ;;  %v1369_v35 = vpop.f32.mrb[27].mxu1 }
 0x25e   : > { %v2389_v36 = vadd.f32 %v4064_v29, %v5250_v34  ;;  %v4066_v37 = vadd.f32 %v4003_v33, %v3843_v31  ;;  %v2141_v38 = vpop.f32.mrb[27].mxu0 }
 0x25f   : > { %v2387_v39 = vadd.f32 %v4065_v32, %v5250_v34  ;;  %v4067_v40 = vadd.f32 %v2141_v38, %v1369_v35 }
 0x260   : > { %v3519_v41 = vpack.c.bf16 %v2389_v36, %v2389_v36  ;;  %v2390_v42 = vadd.f32 %v4066_v37, %v5250_v34 }
 0x261   : > { %v3517_v43 = vpack.c.bf16 %v2387_v39, %v2387_v39  ;;  %v2388_v44 = vadd.f32 %v4067_v40, %v5250_v34 }
 0x262   : > { %2710 = vst.msk [vmem:[%s5257_s14 + $0x68] sm:$0xf] %vm2683_vm0, %v3519_v41  ;;  %v3520_v45 = vpack.c.bf16 %v2390_v42, %v2390_v42  ;;  %v3846_v46 = vpop.f32.mrb[28].mxu1 }
 0x263   : > { %2708 = vst.msk [vmem:[%s5257_s14 + $0x60] sm:$0xf] %vm2683_vm0, %v3517_v43  ;;  %v3518_v47 = vpack.c.bf16 %v2388_v44, %v2388_v44  ;;  %v4006_v48 = vpop.f32.mrb[28].mxu0  ;;  %v1382_v49 = vpop.f32.mrb[29].mxu1 }
 0x264   : > { %2711 = vst.msk [vmem:[%s5257_s14 + $0x6c] sm:$0xf] %vm2683_vm0, %v3520_v45  ;;  %v4068_v50 = vadd.f32 %v4006_v48, %v3846_v46  ;;  %v2154_v51 = vpop.f32.mrb[29].mxu0  ;;  %v3847_v52 = vpop.f32.mrb[30].mxu1 }
 0x265   : > { %2709 = vst.msk [vmem:[%s5257_s14 + $0x64] sm:$0xf] %vm2683_vm0, %v3518_v47  ;;  %v4069_v53 = vadd.f32 %v2154_v51, %v1382_v49  ;;  %v4007_v54 = vpop.f32.mrb[30].mxu0  ;;  %v1385_v55 = vpop.f32.mrb[31].mxu1 }
 0x266   : > { %v2393_v56 = vadd.f32 %v4068_v50, %v5250_v34  ;;  %v4070_v57 = vadd.f32 %v4007_v54, %v3847_v52  ;;  %v2157_v58 = vpop.f32.mrb[31].mxu0 }
 0x267   : > { %v2391_v59 = vadd.f32 %v4069_v53, %v5250_v34  ;;  %v4071_v60 = vadd.f32 %v2157_v58, %v1385_v55 }
 0x268   : > { %v3523_v61 = vpack.c.bf16 %v2393_v56, %v2393_v56  ;;  %v2394_v62 = vadd.f32 %v4070_v57, %v5250_v34 }
 0x269   : > { %v3521_v63 = vpack.c.bf16 %v2391_v59, %v2391_v59  ;;  %v2392_v0 = vadd.f32 %v4071_v60, %v5250_v34 }
 0x26a   : > { %2714 = vst.msk [vmem:[%s5257_s14 + $0x78] sm:$0xf] %vm2683_vm0, %v3523_v61  ;;  %v3524_v1 = vpack.c.bf16 %v2394_v62, %v2394_v62  ;;  %v3850_v2 = vpop.f32.mrb[32].mxu1 }
 0x26b   : > { %2712 = vst.msk [vmem:[%s5257_s14 + $0x70] sm:$0xf] %vm2683_vm0, %v3521_v63  ;;  %v3522_v3 = vpack.c.bf16 %v2392_v0, %v2392_v0  ;;  %v4010_v4 = vpop.f32.mrb[32].mxu0  ;;  %v1398_v5 = vpop.f32.mrb[33].mxu1 }
 0x26c   : > { %2715 = vst.msk [vmem:[%s5257_s14 + $0x7c] sm:$0xf] %vm2683_vm0, %v3524_v1  ;;  %v4072_v6 = vadd.f32 %v4010_v4, %v3850_v2  ;;  %v2170_v7 = vpop.f32.mrb[33].mxu0  ;;  %v3851_v8 = vpop.f32.mrb[34].mxu1 }
 0x26d   : > { %2713 = vst.msk [vmem:[%s5257_s14 + $0x74] sm:$0xf] %vm2683_vm0, %v3522_v3  ;;  %v4073_v9 = vadd.f32 %v2170_v7, %v1398_v5  ;;  %v4011_v10 = vpop.f32.mrb[34].mxu0  ;;  %v1401_v11 = vpop.f32.mrb[35].mxu1 }
 0x26e   : > { %v2397_v12 = vadd.f32 %v4072_v6, %v5250_v34  ;;  %v4074_v13 = vadd.f32 %v4011_v10, %v3851_v8  ;;  %v2173_v14 = vpop.f32.mrb[35].mxu0 }
 0x26f   : > { %v2395_v15 = vadd.f32 %v4073_v9, %v5250_v34  ;;  %v4075_v16 = vadd.f32 %v2173_v14, %v1401_v11 }
 0x270   : > { %v3527_v17 = vpack.c.bf16 %v2397_v12, %v2397_v12  ;;  %v2398_v18 = vadd.f32 %v4074_v13, %v5250_v34 }
 0x271   : > { %v3525_v19 = vpack.c.bf16 %v2395_v15, %v2395_v15  ;;  %v2396_v20 = vadd.f32 %v4075_v16, %v5250_v34 }
 0x272   : > { %2718 = vst.msk [vmem:[%s5257_s14 + $0x88] sm:$0xf] %vm2683_vm0, %v3527_v17  ;;  %v3528_v21 = vpack.c.bf16 %v2398_v18, %v2398_v18  ;;  %v3854_v22 = vpop.f32.mrb[36].mxu1 }
 0x273   : > { %2716 = vst.msk [vmem:[%s5257_s14 + $0x80] sm:$0xf] %vm2683_vm0, %v3525_v19  ;;  %v3526_v23 = vpack.c.bf16 %v2396_v20, %v2396_v20  ;;  %v4014_v24 = vpop.f32.mrb[36].mxu0  ;;  %v1414_v25 = vpop.f32.mrb[37].mxu1 }
 0x274   : > { %2719 = vst.msk [vmem:[%s5257_s14 + $0x8c] sm:$0xf] %vm2683_vm0, %v3528_v21  ;;  %v4076_v26 = vadd.f32 %v4014_v24, %v3854_v22  ;;  %v2186_v27 = vpop.f32.mrb[37].mxu0  ;;  %v3855_v28 = vpop.f32.mrb[38].mxu1 }
 0x275   : > { %2717 = vst.msk [vmem:[%s5257_s14 + $0x84] sm:$0xf] %vm2683_vm0, %v3526_v23  ;;  %v4077_v29 = vadd.f32 %v2186_v27, %v1414_v25  ;;  %v4015_v30 = vpop.f32.mrb[38].mxu0  ;;  %v1417_v31 = vpop.f32.mrb[39].mxu1 }
 0x276   : > { %v2401_v32 = vadd.f32 %v4076_v26, %v5250_v34  ;;  %v4078_v33 = vadd.f32 %v4015_v30, %v3855_v28  ;;  %v2189_v35 = vpop.f32.mrb[39].mxu0 }
 0x277   : > { %v2399_v36 = vadd.f32 %v4077_v29, %v5250_v34  ;;  %v4079_v37 = vadd.f32 %v2189_v35, %v1417_v31 }
 0x278   : > { %v3531_v38 = vpack.c.bf16 %v2401_v32, %v2401_v32  ;;  %v2402_v39 = vadd.f32 %v4078_v33, %v5250_v34 }
 0x279   : > { %v3529_v40 = vpack.c.bf16 %v2399_v36, %v2399_v36  ;;  %v2400_v41 = vadd.f32 %v4079_v37, %v5250_v34 }
 0x27a   : > { %2722 = vst.msk [vmem:[%s5257_s14 + $0x98] sm:$0xf] %vm2683_vm0, %v3531_v38  ;;  %v3532_v42 = vpack.c.bf16 %v2402_v39, %v2402_v39  ;;  %v3858_v43 = vpop.f32.mrb[40].mxu1 }
 0x27b   : > { %2720 = vst.msk [vmem:[%s5257_s14 + $0x90] sm:$0xf] %vm2683_vm0, %v3529_v40  ;;  %v3530_v44 = vpack.c.bf16 %v2400_v41, %v2400_v41  ;;  %v4018_v45 = vpop.f32.mrb[40].mxu0  ;;  %v1430_v46 = vpop.f32.mrb[41].mxu1 }
 0x27c   : > { %2723 = vst.msk [vmem:[%s5257_s14 + $0x9c] sm:$0xf] %vm2683_vm0, %v3532_v42  ;;  %v4080_v47 = vadd.f32 %v4018_v45, %v3858_v43  ;;  %v2202_v48 = vpop.f32.mrb[41].mxu0  ;;  %v3859_v49 = vpop.f32.mrb[42].mxu1 }
 0x27d   : > { %2721 = vst.msk [vmem:[%s5257_s14 + $0x94] sm:$0xf] %vm2683_vm0, %v3530_v44  ;;  %v4081_v50 = vadd.f32 %v2202_v48, %v1430_v46  ;;  %v4019_v51 = vpop.f32.mrb[42].mxu0  ;;  %v1433_v52 = vpop.f32.mrb[43].mxu1 }
 0x27e   : > { %v2405_v53 = vadd.f32 %v4080_v47, %v5250_v34  ;;  %v4082_v54 = vadd.f32 %v4019_v51, %v3859_v49  ;;  %v2205_v55 = vpop.f32.mrb[43].mxu0 }
 0x27f   : > { %v2403_v56 = vadd.f32 %v4081_v50, %v5250_v34  ;;  %v4083_v57 = vadd.f32 %v2205_v55, %v1433_v52 }
 0x280   : > { %v3535_v58 = vpack.c.bf16 %v2405_v53, %v2405_v53  ;;  %v2406_v59 = vadd.f32 %v4082_v54, %v5250_v34 }
 0x281   : > { %v3533_v60 = vpack.c.bf16 %v2403_v56, %v2403_v56  ;;  %v2404_v61 = vadd.f32 %v4083_v57, %v5250_v34 }
 0x282   : > { %2726 = vst.msk [vmem:[%s5257_s14 + $0xa8] sm:$0xf] %vm2683_vm0, %v3535_v58  ;;  %v3536_v62 = vpack.c.bf16 %v2406_v59, %v2406_v59  ;;  %v3862_v63 = vpop.f32.mrb[44].mxu1 }
 0x283   : > { %2724 = vst.msk [vmem:[%s5257_s14 + $0xa0] sm:$0xf] %vm2683_vm0, %v3533_v60  ;;  %v3534_v0 = vpack.c.bf16 %v2404_v61, %v2404_v61  ;;  %v4022_v1 = vpop.f32.mrb[44].mxu0  ;;  %v1446_v2 = vpop.f32.mrb[45].mxu1 }
 0x284   : > { %2727 = vst.msk [vmem:[%s5257_s14 + $0xac] sm:$0xf] %vm2683_vm0, %v3536_v62  ;;  %v4084_v3 = vadd.f32 %v4022_v1, %v3862_v63  ;;  %v2218_v4 = vpop.f32.mrb[45].mxu0  ;;  %v3863_v5 = vpop.f32.mrb[46].mxu1 }
 0x285   : > { %2725 = vst.msk [vmem:[%s5257_s14 + $0xa4] sm:$0xf] %vm2683_vm0, %v3534_v0  ;;  %v4085_v6 = vadd.f32 %v2218_v4, %v1446_v2  ;;  %v4023_v7 = vpop.f32.mrb[46].mxu0  ;;  %v1449_v8 = vpop.f32.mrb[47].mxu1 }
 0x286   : > { %v2409_v9 = vadd.f32 %v4084_v3, %v5250_v34  ;;  %v4086_v10 = vadd.f32 %v4023_v7, %v3863_v5  ;;  %v2221_v11 = vpop.f32.mrb[47].mxu0 }
 0x287   : > { %v2407_v12 = vadd.f32 %v4085_v6, %v5250_v34  ;;  %v4087_v13 = vadd.f32 %v2221_v11, %v1449_v8 }
 0x288   : > { %v3539_v14 = vpack.c.bf16 %v2409_v9, %v2409_v9  ;;  %v2410_v15 = vadd.f32 %v4086_v10, %v5250_v34 }
 0x289   : > { %v3537_v16 = vpack.c.bf16 %v2407_v12, %v2407_v12  ;;  %v2408_v17 = vadd.f32 %v4087_v13, %v5250_v34 }
 0x28a   : > { %2730 = vst.msk [vmem:[%s5257_s14 + $0xb8] sm:$0xf] %vm2683_vm0, %v3539_v14  ;;  %v3540_v18 = vpack.c.bf16 %v2410_v15, %v2410_v15  ;;  %v3866_v19 = vpop.f32.mrb[48].mxu1 }
 0x28b   : > { %2728 = vst.msk [vmem:[%s5257_s14 + $0xb0] sm:$0xf] %vm2683_vm0, %v3537_v16  ;;  %v3538_v20 = vpack.c.bf16 %v2408_v17, %v2408_v17  ;;  %v4026_v21 = vpop.f32.mrb[48].mxu0  ;;  %v1462_v22 = vpop.f32.mrb[49].mxu1 }
 0x28c   : > { %2731 = vst.msk [vmem:[%s5257_s14 + $0xbc] sm:$0xf] %vm2683_vm0, %v3540_v18  ;;  %v4088_v23 = vadd.f32 %v4026_v21, %v3866_v19  ;;  %v2234_v24 = vpop.f32.mrb[49].mxu0  ;;  %v3867_v25 = vpop.f32.mrb[50].mxu1 }
 0x28d   : > { %2729 = vst.msk [vmem:[%s5257_s14 + $0xb4] sm:$0xf] %vm2683_vm0, %v3538_v20  ;;  %v4089_v26 = vadd.f32 %v2234_v24, %v1462_v22  ;;  %v4027_v27 = vpop.f32.mrb[50].mxu0  ;;  %v1465_v28 = vpop.f32.mrb[51].mxu1 }
 0x28e   : > { %v2413_v29 = vadd.f32 %v4088_v23, %v5250_v34  ;;  %v4090_v30 = vadd.f32 %v4027_v27, %v3867_v25  ;;  %v2237_v31 = vpop.f32.mrb[51].mxu0 }
 0x28f   : > { %v2411_v32 = vadd.f32 %v4089_v26, %v5250_v34  ;;  %v4091_v33 = vadd.f32 %v2237_v31, %v1465_v28 }
 0x290   : > { %v3543_v35 = vpack.c.bf16 %v2413_v29, %v2413_v29  ;;  %v2414_v36 = vadd.f32 %v4090_v30, %v5250_v34 }
 0x291   : > { %v3541_v37 = vpack.c.bf16 %v2411_v32, %v2411_v32  ;;  %v2412_v38 = vadd.f32 %v4091_v33, %v5250_v34 }
 0x292   : > { %2734 = vst.msk [vmem:[%s5257_s14 + $0xc8] sm:$0xf] %vm2683_vm0, %v3543_v35  ;;  %v3544_v39 = vpack.c.bf16 %v2414_v36, %v2414_v36  ;;  %v3870_v40 = vpop.f32.mrb[52].mxu1 }
 0x293   : > { %2732 = vst.msk [vmem:[%s5257_s14 + $0xc0] sm:$0xf] %vm2683_vm0, %v3541_v37  ;;  %v3542_v41 = vpack.c.bf16 %v2412_v38, %v2412_v38  ;;  %v4030_v42 = vpop.f32.mrb[52].mxu0  ;;  %v1478_v43 = vpop.f32.mrb[53].mxu1 }
 0x294   : > { %2735 = vst.msk [vmem:[%s5257_s14 + $0xcc] sm:$0xf] %vm2683_vm0, %v3544_v39  ;;  %v4092_v44 = vadd.f32 %v4030_v42, %v3870_v40  ;;  %v2250_v45 = vpop.f32.mrb[53].mxu0  ;;  %v3871_v46 = vpop.f32.mrb[54].mxu1 }
 0x295   : > { %2733 = vst.msk [vmem:[%s5257_s14 + $0xc4] sm:$0xf] %vm2683_vm0, %v3542_v41  ;;  %v4093_v47 = vadd.f32 %v2250_v45, %v1478_v43  ;;  %v4031_v48 = vpop.f32.mrb[54].mxu0  ;;  %v1481_v49 = vpop.f32.mrb[55].mxu1 }
 0x296   : > { %v2417_v50 = vadd.f32 %v4092_v44, %v5250_v34  ;;  %v4094_v51 = vadd.f32 %v4031_v48, %v3871_v46  ;;  %v2253_v52 = vpop.f32.mrb[55].mxu0 }
 0x297   : > { %v2415_v53 = vadd.f32 %v4093_v47, %v5250_v34  ;;  %v4095_v54 = vadd.f32 %v2253_v52, %v1481_v49 }
 0x298   : > { %v3547_v55 = vpack.c.bf16 %v2417_v50, %v2417_v50  ;;  %v2418_v56 = vadd.f32 %v4094_v51, %v5250_v34 }
 0x299   : > { %v3545_v57 = vpack.c.bf16 %v2415_v53, %v2415_v53  ;;  %v2416_v58 = vadd.f32 %v4095_v54, %v5250_v34 }
 0x29a   : > { %2738 = vst.msk [vmem:[%s5257_s14 + $0xd8] sm:$0xf] %vm2683_vm0, %v3547_v55  ;;  %v3548_v59 = vpack.c.bf16 %v2418_v56, %v2418_v56  ;;  %v3874_v60 = vpop.f32.mrb[56].mxu1 }
 0x29b   : > { %2736 = vst.msk [vmem:[%s5257_s14 + $0xd0] sm:$0xf] %vm2683_vm0, %v3545_v57  ;;  %v3546_v61 = vpack.c.bf16 %v2416_v58, %v2416_v58  ;;  %v4034_v62 = vpop.f32.mrb[56].mxu0  ;;  %v1494_v63 = vpop.f32.mrb[57].mxu1 }
 0x29c   : > { %2739 = vst.msk [vmem:[%s5257_s14 + $0xdc] sm:$0xf] %vm2683_vm0, %v3548_v59  ;;  %v4096_v0 = vadd.f32 %v4034_v62, %v3874_v60  ;;  %v2266_v1 = vpop.f32.mrb[57].mxu0  ;;  %v3875_v2 = vpop.f32.mrb[58].mxu1 }
 0x29d   : > { %2737 = vst.msk [vmem:[%s5257_s14 + $0xd4] sm:$0xf] %vm2683_vm0, %v3546_v61  ;;  %v4097_v3 = vadd.f32 %v2266_v1, %v1494_v63  ;;  %v4035_v4 = vpop.f32.mrb[58].mxu0  ;;  %v1497_v5 = vpop.f32.mrb[59].mxu1 }
 0x29e   : > { %v2421_v6 = vadd.f32 %v4096_v0, %v5250_v34  ;;  %v4098_v7 = vadd.f32 %v4035_v4, %v3875_v2  ;;  %v2269_v8 = vpop.f32.mrb[59].mxu0 }
 0x29f   : > { %v2419_v9 = vadd.f32 %v4097_v3, %v5250_v34  ;;  %v4099_v10 = vadd.f32 %v2269_v8, %v1497_v5 }
 0x2a0   : > { %v3551_v11 = vpack.c.bf16 %v2421_v6, %v2421_v6  ;;  %v2422_v12 = vadd.f32 %v4098_v7, %v5250_v34 }
 0x2a1   : > { %v3549_v13 = vpack.c.bf16 %v2419_v9, %v2419_v9  ;;  %v2420_v14 = vadd.f32 %v4099_v10, %v5250_v34 }
 0x2a2   : > { %2742 = vst.msk [vmem:[%s5257_s14 + $0xe8] sm:$0xf] %vm2683_vm0, %v3551_v11  ;;  %v3552_v15 = vpack.c.bf16 %v2422_v12, %v2422_v12  ;;  %v3878_v16 = vpop.f32.mrb[60].mxu1 }
 0x2a3   : > { %2740 = vst.msk [vmem:[%s5257_s14 + $0xe0] sm:$0xf] %vm2683_vm0, %v3549_v13  ;;  %v3550_v17 = vpack.c.bf16 %v2420_v14, %v2420_v14  ;;  %v4038_v18 = vpop.f32.mrb[60].mxu0  ;;  %v1510_v19 = vpop.f32.mrb[61].mxu1 }
 0x2a4   : > { %2743 = vst.msk [vmem:[%s5257_s14 + $0xec] sm:$0xf] %vm2683_vm0, %v3552_v15  ;;  %v4100_v20 = vadd.f32 %v4038_v18, %v3878_v16  ;;  %v2282_v21 = vpop.f32.mrb[61].mxu0  ;;  %v3879_v22 = vpop.f32.mrb[62].mxu1 }
 0x2a5   : > { %2741 = vst.msk [vmem:[%s5257_s14 + $0xe4] sm:$0xf] %vm2683_vm0, %v3550_v17  ;;  %v4101_v23 = vadd.f32 %v2282_v21, %v1510_v19  ;;  %v4039_v24 = vpop.f32.mrb[62].mxu0  ;;  %v1513_v25 = vpop.f32.mrb[63].mxu1 }
 0x2a6   : > { %v2425_v26 = vadd.f32 %v4100_v20, %v5250_v34  ;;  %v4102_v27 = vadd.f32 %v4039_v24, %v3879_v22  ;;  %v2285_v28 = vpop.f32.mrb[63].mxu0 }
 0x2a7   : > { %v2423_v29 = vadd.f32 %v4101_v23, %v5250_v34  ;;  %v4103_v30 = vadd.f32 %v2285_v28, %v1513_v25  ;;  %2754 = sbr.rel (!%p5659_p7) target bundleno = 777 (0x309), region = 64 }
 0x2a8   : > { %v3555_v31 = vpack.c.bf16 %v2425_v26, %v2425_v26  ;;  %v2426_v32 = vadd.f32 %v4102_v27, %v5250_v34 }
 0x2a9   : > { %v3553_v33 = vpack.c.bf16 %v2423_v29, %v2423_v29  ;;  %v2424_v35 = vadd.f32 %v4103_v30, %v5250_v34 }
 0x2aa   : > { %2746 = vst.msk [vmem:[%s5257_s14 + $0xf8] sm:$0xf] %vm2683_vm0, %v3555_v31  ;;  %v3556_v36 = vpack.c.bf16 %v2426_v32, %v2426_v32 }
 0x2ab   : > { %2744 = vst.msk [vmem:[%s5257_s14 + $0xf0] sm:$0xf] %vm2683_vm0, %v3553_v33  ;;  %v3554_v37 = vpack.c.bf16 %v2424_v35, %v2424_v35 }
 0x2ac   : > { %2747 = vst.msk [vmem:[%s5257_s14 + $0xfc] sm:$0xf] %vm2683_vm0, %v3556_v36 }
 0x2ad   : > { %2745 = vst.msk [vmem:[%s5257_s14 + $0xf4] sm:$0xf] %vm2683_vm0, %v3554_v37 }
 0x2ae   : > { %s5676_s8 = smov (!%p2757_p4, %s2756_s8), 64 }
 0x2af   : > { %s3474_s23 = sshll.u32 %s5676_s8, 6 }
 0x2b0   : > { %p3477_p1 = scmp.eq.s32.totalorder %s3474_s23, 0 }
 0x2b1   : > { %s5460_s9 = sshrl.u32 (!%p3477_p1), %s5676_s8, 6 }
 0x2b2   : > { %2765 = sbr.rel (%p3477_p1) target bundleno = 777 (0x309), region = 68  ;;  %p3478_p3 = scmp.le.s32.totalorder (!%p3477_p1), %s5460_s9, 0 }
 0x2b9   : > { %3217 = sbr.rel (%p3478_p3) target bundleno = 756 (0x2f4), region = 174  ;;  %s5660_s5 = smov (!%p3478_p3), %s5454_s26 }
 0x2ba   : > { %s5661_s11 = smov (!%p3478_p3), %s5257_s14  ;;  %s5469_s21 = smov (!%p3478_p3), 0  }
 0x2bb   : > { %s5471_s22 = smov (!%p3478_p3), 0  }
 0x2c0 LB: >> { %v2781_v34 = vld [vmem:[%s4566_s11] sm:$0xf]  ;;  %v2783_v38 = vld [vmem:[%s4566_s11 + $0x4] sm:$0xf]  ;;  %v2785_v39 = vld [vmem:[%s4566_s11 + $0x8] sm:$0xf]  ;;  %s4574_s22 = sphi %s5471_s22, %s2775_s22   ;;  %s4570_s21 = sphi %s5469_s21, %s5662_s21   ;;  %s4566_s11 = sphi %s5661_s11, %s2914_s11   ;;  %s4562_s5 = sphi %s5660_s5, %s2915_s5  }
 0x2c1   : >> { %2782 = vst [vmem:[%s4562_s5] sm:$0xf] %v2781_v34  ;;  %2784 = vst [vmem:[%s4562_s5 + $0x4] sm:$0xf] %v2783_v38  ;;  %v2787_v40 = vld [vmem:[%s4566_s11 + $0xc] sm:$0xf]  ;;  %s2909_s19 = sadd.s32 1, %s4570_s21 }
 0x2c2   : >> { %2786 = vst [vmem:[%s4562_s5 + $0x8] sm:$0xf] %v2785_v39  ;;  %v2789_v41 = vld [vmem:[%s4566_s11 + $0x10] sm:$0xf]  ;;  %v2791_v42 = vld [vmem:[%s4566_s11 + $0x14] sm:$0xf]  ;;  %p2910_p8 = scmp.ge.s32.totalorder %s2909_s19, %s5460_s9 }
 0x2c3   : >> { %2788 = vst [vmem:[%s4562_s5 + $0xc] sm:$0xf] %v2787_v40  ;;  %2790 = vst [vmem:[%s4562_s5 + $0x10] sm:$0xf] %v2789_v41  ;;  %v2793_v43 = vld [vmem:[%s4566_s11 + $0x18] sm:$0xf] }
 0x2c4   : >> { %2792 = vst [vmem:[%s4562_s5 + $0x14] sm:$0xf] %v2791_v42  ;;  %v2795_v44 = vld [vmem:[%s4566_s11 + $0x1c] sm:$0xf]  ;;  %v2797_v45 = vld [vmem:[%s4566_s11 + $0x20] sm:$0xf] }
 0x2c5   : >> { %2794 = vst [vmem:[%s4562_s5 + $0x18] sm:$0xf] %v2793_v43  ;;  %2796 = vst [vmem:[%s4562_s5 + $0x1c] sm:$0xf] %v2795_v44  ;;  %v2799_v46 = vld [vmem:[%s4566_s11 + $0x24] sm:$0xf] }
 0x2c6   : >> { %2798 = vst [vmem:[%s4562_s5 + $0x20] sm:$0xf] %v2797_v45  ;;  %v2801_v47 = vld [vmem:[%s4566_s11 + $0x28] sm:$0xf]  ;;  %v2803_v48 = vld [vmem:[%s4566_s11 + $0x2c] sm:$0xf] }
 0x2c7   : >> { %2800 = vst [vmem:[%s4562_s5 + $0x24] sm:$0xf] %v2799_v46  ;;  %2802 = vst [vmem:[%s4562_s5 + $0x28] sm:$0xf] %v2801_v47  ;;  %v2805_v49 = vld [vmem:[%s4566_s11 + $0x30] sm:$0xf] }
 0x2c8   : >> { %2804 = vst [vmem:[%s4562_s5 + $0x2c] sm:$0xf] %v2803_v48  ;;  %v2807_v50 = vld [vmem:[%s4566_s11 + $0x34] sm:$0xf]  ;;  %v2809_v51 = vld [vmem:[%s4566_s11 + $0x38] sm:$0xf] }
 0x2c9   : >> { %2806 = vst [vmem:[%s4562_s5 + $0x30] sm:$0xf] %v2805_v49  ;;  %2808 = vst [vmem:[%s4562_s5 + $0x34] sm:$0xf] %v2807_v50  ;;  %v2811_v52 = vld [vmem:[%s4566_s11 + $0x3c] sm:$0xf] }
 0x2ca   : >> { %2810 = vst [vmem:[%s4562_s5 + $0x38] sm:$0xf] %v2809_v51  ;;  %v2813_v53 = vld [vmem:[%s4566_s11 + $0x40] sm:$0xf]  ;;  %v2815_v54 = vld [vmem:[%s4566_s11 + $0x44] sm:$0xf] }
 0x2cb   : >> { %2812 = vst [vmem:[%s4562_s5 + $0x3c] sm:$0xf] %v2811_v52  ;;  %2814 = vst [vmem:[%s4562_s5 + $0x40] sm:$0xf] %v2813_v53  ;;  %v2817_v55 = vld [vmem:[%s4566_s11 + $0x48] sm:$0xf] }
 0x2cc   : >> { %2816 = vst [vmem:[%s4562_s5 + $0x44] sm:$0xf] %v2815_v54  ;;  %v2819_v56 = vld [vmem:[%s4566_s11 + $0x4c] sm:$0xf]  ;;  %v2821_v57 = vld [vmem:[%s4566_s11 + $0x50] sm:$0xf] }
 0x2cd   : >> { %2818 = vst [vmem:[%s4562_s5 + $0x48] sm:$0xf] %v2817_v55  ;;  %2820 = vst [vmem:[%s4562_s5 + $0x4c] sm:$0xf] %v2819_v56  ;;  %v2823_v58 = vld [vmem:[%s4566_s11 + $0x54] sm:$0xf] }
 0x2ce   : >> { %2822 = vst [vmem:[%s4562_s5 + $0x50] sm:$0xf] %v2821_v57  ;;  %v2825_v59 = vld [vmem:[%s4566_s11 + $0x58] sm:$0xf]  ;;  %v2827_v60 = vld [vmem:[%s4566_s11 + $0x5c] sm:$0xf] }
 0x2cf   : >> { %2824 = vst [vmem:[%s4562_s5 + $0x54] sm:$0xf] %v2823_v58  ;;  %2826 = vst [vmem:[%s4562_s5 + $0x58] sm:$0xf] %v2825_v59  ;;  %v2829_v61 = vld [vmem:[%s4566_s11 + $0x60] sm:$0xf] }
 0x2d0   : >> { %2828 = vst [vmem:[%s4562_s5 + $0x5c] sm:$0xf] %v2827_v60  ;;  %v2831_v62 = vld [vmem:[%s4566_s11 + $0x64] sm:$0xf]  ;;  %v2833_v63 = vld [vmem:[%s4566_s11 + $0x68] sm:$0xf] }
 0x2d1   : >> { %2830 = vst [vmem:[%s4562_s5 + $0x60] sm:$0xf] %v2829_v61  ;;  %2832 = vst [vmem:[%s4562_s5 + $0x64] sm:$0xf] %v2831_v62  ;;  %v2835_v0 = vld [vmem:[%s4566_s11 + $0x6c] sm:$0xf] }
 0x2d2   : >> { %2834 = vst [vmem:[%s4562_s5 + $0x68] sm:$0xf] %v2833_v63  ;;  %v2837_v1 = vld [vmem:[%s4566_s11 + $0x70] sm:$0xf]  ;;  %v2839_v2 = vld [vmem:[%s4566_s11 + $0x74] sm:$0xf] }
 0x2d3   : >> { %2836 = vst [vmem:[%s4562_s5 + $0x6c] sm:$0xf] %v2835_v0  ;;  %2838 = vst [vmem:[%s4562_s5 + $0x70] sm:$0xf] %v2837_v1  ;;  %v2841_v3 = vld [vmem:[%s4566_s11 + $0x78] sm:$0xf] }
 0x2d4   : >> { %2840 = vst [vmem:[%s4562_s5 + $0x74] sm:$0xf] %v2839_v2  ;;  %v2843_v4 = vld [vmem:[%s4566_s11 + $0x7c] sm:$0xf]  ;;  %v2845_v5 = vld [vmem:[%s4566_s11 + $0x80] sm:$0xf] }
 0x2d5   : >> { %2842 = vst [vmem:[%s4562_s5 + $0x78] sm:$0xf] %v2841_v3  ;;  %2844 = vst [vmem:[%s4562_s5 + $0x7c] sm:$0xf] %v2843_v4  ;;  %v2847_v6 = vld [vmem:[%s4566_s11 + $0x84] sm:$0xf] }
 0x2d6   : >> { %2846 = vst [vmem:[%s4562_s5 + $0x80] sm:$0xf] %v2845_v5  ;;  %v2849_v7 = vld [vmem:[%s4566_s11 + $0x88] sm:$0xf]  ;;  %v2851_v8 = vld [vmem:[%s4566_s11 + $0x8c] sm:$0xf] }
 0x2d7   : >> { %2848 = vst [vmem:[%s4562_s5 + $0x84] sm:$0xf] %v2847_v6  ;;  %2850 = vst [vmem:[%s4562_s5 + $0x88] sm:$0xf] %v2849_v7  ;;  %v2853_v9 = vld [vmem:[%s4566_s11 + $0x90] sm:$0xf] }
 0x2d8   : >> { %2852 = vst [vmem:[%s4562_s5 + $0x8c] sm:$0xf] %v2851_v8  ;;  %v2855_v10 = vld [vmem:[%s4566_s11 + $0x94] sm:$0xf]  ;;  %v2857_v11 = vld [vmem:[%s4566_s11 + $0x98] sm:$0xf] }
 0x2d9   : >> { %2854 = vst [vmem:[%s4562_s5 + $0x90] sm:$0xf] %v2853_v9  ;;  %2856 = vst [vmem:[%s4562_s5 + $0x94] sm:$0xf] %v2855_v10  ;;  %v2859_v12 = vld [vmem:[%s4566_s11 + $0x9c] sm:$0xf] }
 0x2da   : >> { %2858 = vst [vmem:[%s4562_s5 + $0x98] sm:$0xf] %v2857_v11  ;;  %v2861_v13 = vld [vmem:[%s4566_s11 + $0xa0] sm:$0xf]  ;;  %v2863_v14 = vld [vmem:[%s4566_s11 + $0xa4] sm:$0xf] }
 0x2db   : >> { %2860 = vst [vmem:[%s4562_s5 + $0x9c] sm:$0xf] %v2859_v12  ;;  %2862 = vst [vmem:[%s4562_s5 + $0xa0] sm:$0xf] %v2861_v13  ;;  %v2865_v15 = vld [vmem:[%s4566_s11 + $0xa8] sm:$0xf] }
 0x2dc   : >> { %2864 = vst [vmem:[%s4562_s5 + $0xa4] sm:$0xf] %v2863_v14  ;;  %v2867_v16 = vld [vmem:[%s4566_s11 + $0xac] sm:$0xf]  ;;  %v2869_v17 = vld [vmem:[%s4566_s11 + $0xb0] sm:$0xf] }
 0x2dd   : >> { %2866 = vst [vmem:[%s4562_s5 + $0xa8] sm:$0xf] %v2865_v15  ;;  %2868 = vst [vmem:[%s4562_s5 + $0xac] sm:$0xf] %v2867_v16  ;;  %v2871_v18 = vld [vmem:[%s4566_s11 + $0xb4] sm:$0xf] }
 0x2de   : >> { %2870 = vst [vmem:[%s4562_s5 + $0xb0] sm:$0xf] %v2869_v17  ;;  %v2873_v19 = vld [vmem:[%s4566_s11 + $0xb8] sm:$0xf]  ;;  %v2875_v20 = vld [vmem:[%s4566_s11 + $0xbc] sm:$0xf] }
 0x2df   : >> { %2872 = vst [vmem:[%s4562_s5 + $0xb4] sm:$0xf] %v2871_v18  ;;  %2874 = vst [vmem:[%s4562_s5 + $0xb8] sm:$0xf] %v2873_v19  ;;  %v2877_v21 = vld [vmem:[%s4566_s11 + $0xc0] sm:$0xf] }
 0x2e0   : >> { %2876 = vst [vmem:[%s4562_s5 + $0xbc] sm:$0xf] %v2875_v20  ;;  %v2879_v22 = vld [vmem:[%s4566_s11 + $0xc4] sm:$0xf]  ;;  %v2881_v23 = vld [vmem:[%s4566_s11 + $0xc8] sm:$0xf] }
 0x2e1   : >> { %2878 = vst [vmem:[%s4562_s5 + $0xc0] sm:$0xf] %v2877_v21  ;;  %2880 = vst [vmem:[%s4562_s5 + $0xc4] sm:$0xf] %v2879_v22  ;;  %v2883_v24 = vld [vmem:[%s4566_s11 + $0xcc] sm:$0xf] }
 0x2e2   : >> { %2882 = vst [vmem:[%s4562_s5 + $0xc8] sm:$0xf] %v2881_v23  ;;  %v2885_v25 = vld [vmem:[%s4566_s11 + $0xd0] sm:$0xf]  ;;  %v2887_v26 = vld [vmem:[%s4566_s11 + $0xd4] sm:$0xf] }
 0x2e3   : >> { %2884 = vst [vmem:[%s4562_s5 + $0xcc] sm:$0xf] %v2883_v24  ;;  %2886 = vst [vmem:[%s4562_s5 + $0xd0] sm:$0xf] %v2885_v25  ;;  %v2889_v27 = vld [vmem:[%s4566_s11 + $0xd8] sm:$0xf] }
 0x2e4   : >> { %2888 = vst [vmem:[%s4562_s5 + $0xd4] sm:$0xf] %v2887_v26  ;;  %v2891_v28 = vld [vmem:[%s4566_s11 + $0xdc] sm:$0xf]  ;;  %v2893_v29 = vld [vmem:[%s4566_s11 + $0xe0] sm:$0xf] }
 0x2e5   : >> { %2890 = vst [vmem:[%s4562_s5 + $0xd8] sm:$0xf] %v2889_v27  ;;  %2892 = vst [vmem:[%s4562_s5 + $0xdc] sm:$0xf] %v2891_v28  ;;  %v2895_v30 = vld [vmem:[%s4566_s11 + $0xe4] sm:$0xf] }
 0x2e6   : >> { %2894 = vst [vmem:[%s4562_s5 + $0xe0] sm:$0xf] %v2893_v29  ;;  %v2897_v31 = vld [vmem:[%s4566_s11 + $0xe8] sm:$0xf]  ;;  %v2899_v32 = vld [vmem:[%s4566_s11 + $0xec] sm:$0xf] }
 0x2e7   : >> { %2896 = vst [vmem:[%s4562_s5 + $0xe4] sm:$0xf] %v2895_v30  ;;  %2898 = vst [vmem:[%s4562_s5 + $0xe8] sm:$0xf] %v2897_v31  ;;  %v2901_v33 = vld [vmem:[%s4566_s11 + $0xf0] sm:$0xf] }
 0x2e8   : >> { %2900 = vst [vmem:[%s4562_s5 + $0xec] sm:$0xf] %v2899_v32  ;;  %v2903_v35 = vld [vmem:[%s4566_s11 + $0xf4] sm:$0xf]  ;;  %v2905_v36 = vld [vmem:[%s4566_s11 + $0xf8] sm:$0xf] }
 0x2e9   : >> { %2902 = vst [vmem:[%s4562_s5 + $0xf0] sm:$0xf] %v2901_v33  ;;  %2904 = vst [vmem:[%s4562_s5 + $0xf4] sm:$0xf] %v2903_v35  ;;  %v2907_v37 = vld [vmem:[%s4566_s11 + $0xfc] sm:$0xf] }
 0x2ea   : >> { %2906 = vst [vmem:[%s4562_s5 + $0xf8] sm:$0xf] %v2905_v36  ;;  %2908 = vst [vmem:[%s4562_s5 + $0xfc] sm:$0xf] %v2907_v37  ;;  %s5678_s19 = smov (%p2910_p8, %s2909_s19), 0  ;;  %s2775_s22 = sadd.s32 1, %s4574_s22  }
 0x2eb   : >> { %s3479_s20 = sshll.u32 %s5678_s19, 8  ;;  %p2774_p0 = scmp.ge.s32.totalorder %s2775_s22, %s5460_s9 }
 0x2ec   : >> { %s2914_s11 = scalar_lea.vmem %s5257_s14, %s3479_s20 [#allocation10]   ;;  %s2915_s5 = scalar_lea.vmem %s5454_s26, %s3479_s20  }
 0x2ed   : >> { %s5662_s21 = smov %s5678_s19  ;;  %2777 = sbr.rel (!%p2774_p0) target bundleno = 704 (0x2c0), region = 180 }
 0x2f4 PF: > { %s5628_s28 = sand.u32 63, %s5676_s8   ;;  %s3558_s10 = sshll.u32 %s5460_s9, 8 }
 0x2f5   : > { %s2920_s7 = scalar_lea.vmem %s5257_s14, %s3558_s10 [#allocation10]   ;;  %s2922_s13 = scalar_lea.vmem %s5454_s26, %s3558_s10  }
 0x2f6   : > { %p3484_p2 = scmp.le.s32.totalorder %s5628_s28, 0 }
 0x2f7   : > { %s4576_s29 = smov (!%p3484_p2), %s2922_s13   ;;  %s4580_s16 = smov (!%p3484_p2), %s2920_s7  }
 0x2f8   : > { %3231 = sbr.rel (%p3484_p2) target bundleno = 777 (0x309), region = 185  ;;  %s4584_s17 = smov (!%p3484_p2), 0  }
 0x2f9   : > { %s4588_s18 = smov (!%p3484_p2), 0  }
 0x2ff LB: >> { %v2932_v34 = vld [vmem:[%s4582_s16] sm:$0xf]  ;;  %s2934_s8 = sadd.s32 1, %s4586_s17  ;;  %s2926_s18 = sadd.s32 1, %s4590_s18   ;;  %s4590_s18 = sphi %s4588_s18, %s2926_s18   ;;  %s4586_s17 = sphi %s4584_s17, %s4585_s17   ;;  %s4582_s16 = sphi %s4580_s16, %s2939_s16   ;;  %s4578_s29 = sphi %s4576_s29, %s2940_s29  }
 0x300   : >> { %2933 = vst [vmem:[%s4578_s29] sm:$0xf] %v2932_v34  ;;  %p2935_p11 = scmp.ge.s32.totalorder %s2934_s8, %s5628_s28  ;;  %p2925_p5 = scmp.ge.s32.totalorder %s2926_s18, %s5628_s28 }
 0x302   : >> { %s5680_s8 = smov (%p2935_p11, %s2934_s8), 0  ;;  %2928 = sbr.rel (!%p2925_p5) target bundleno = 767 (0x2ff), region = 191 }
 0x303   : >> { %s3485_s14 = sshll.u32 %s5680_s8, 2  ;;  %s4585_s17 = smov %s5680_s8  }
 0x304   : >> { %s2939_s16 = scalar_lea.vmem %s2920_s7, %s3485_s14 [#allocation10]   ;;  %s2940_s29 = scalar_lea.vmem %s2922_s13, %s3485_s14  }
 0x309 PF: > { %p23_p10 = scmp.ge.s32.totalorder %s4664_s27, 7   ;;  %s5663_s23 = smov %s4550_s24 }
 0x30a   : > { %s5664_s24 = smov %s4554_s25  ;;  %s5665_s25 = smov %s4674_s30 }
 0x30b   : > { %s5666_s26 = smov %s4664_s27  ;;  %25 = sbr.rel (!%p23_p10) target bundleno = 9 (0x9), region = 202 }
 0x312   :  { %3127 = vsyncpa [#allocation4], 1 }
 0x313   :  { %3129 = vsyncpa [#allocation4 + $0x1], 1 }
 0x314   :  { %3130 = vsyncpa [#allocation6], 1 }
 0x315   :  { %3132 = vsyncpa [#allocation6 + $0x1], 1 }
 0x316   :  { %3133 = vsyncpa [#allocation9], 1 }
 0x317   :  { %3135 = vsyncpa [#allocation9 + $0x1], 1 }

</bundles_post_ra>
